<compile_context>
chip_gen: v6e
topology: v6e:2x2x1
jax: 0.10.0
libtpu: 0.0.40
codegen_flags: <defaults>
</compile_context>

<pallas_src>
import functools

import jax
import jax.numpy as jnp
from jax.experimental import pallas as pl
from jax.experimental.pallas import tpu as pltpu

MAX_DIM = 64 * 16
LRELU_SLOPE = 0.01
BN_EPS = 1e-5


def _round_up(x, m):
    return (x + m - 1) // m * m


def _tc_per_chip():
    # Safe best-effort query; returns 1 if the attribute is unavailable.
    try:
        return max(1, int(getattr(jax.devices()[0], "num_cores", 1)))
    except Exception:
        return 1


_TC_PER_CHIP = _tc_per_chip()


# ----------------------------- Pallas kernel ------------------------------ #
def _fused_matmul_kernel(x_ref, w_ref, shift_ref, o_ref, acc_ref, *, act):
    """One (TM,TK)@(TK,TN) step; shift + activation applied at the last K step.

    Grid is (group, i, j, k); BN scale is already folded into the weights."""
    k = pl.program_id(3)

    @pl.when(k == 0)
    def _():
        acc_ref[...] = jnp.zeros_like(acc_ref)

    acc_ref[...] += jnp.dot(x_ref[...], w_ref[...],
                            preferred_element_type=jnp.float32)

    @pl.when(k == pl.num_programs(3) - 1)
    def _():
        y = acc_ref[...] + shift_ref[...]                    # f32 epilogue
        if act == "lrelu":
            y = jnp.where(y >= 0.0, y, LRELU_SLOPE * y)
        elif act == "relu":
            y = jnp.maximum(y, 0.0)
        elif act == "sigmoid":
            y = jax.nn.sigmoid(y)
        o_ref[...] = y.astype(o_ref.dtype)


def _finalize_prep(Wms, bias, scale, shift, act, out_dtype):
    """Hoisted (one-time) weight prep.

    Wms: list of (K, Cout) matrices (one per parity group), feature order
    (ky, kx, c).  BN scale is folded into weight columns, conv bias + BN shift
    into a single per-channel shift.  Everything is padded and cast once."""
    K, N = Wms[0].shape
    G = len(Wms)
    TK = min(512, _round_up(K, 128))
    TN = min(512, _round_up(N, 128))
    Kp = _round_up(K, TK)
    Np = _round_up(N, TN)
    wp = jnp.stack([
        jnp.pad(Wm * scale[None, :], ((0, Kp - K), (0, Np - N)))
        for Wm in Wms
    ]).astype(jnp.bfloat16)                                  # (G, Kp, Np)
    fused_shift = (bias * scale + shift).astype(jnp.float32)
    hp = jnp.tile(jnp.pad(fused_shift, (0, Np - N)).reshape(1, 1, Np),
                  (G, 1, 1))                                 # (G, 1, Np) f32
    return {"wp": wp, "shift": hp, "act": act, "out_dtype": out_dtype,
            "K": K, "N": N, "TK": TK, "TN": TN}


def _make_conv_prep(W, bias, scale, shift, act, out_dtype):
    """W: (Cout, Cin, KH, KW) PyTorch Conv2d weight -> single-group prep."""
    Cout = W.shape[0]
    Wm = W.transpose(2, 3, 1, 0).reshape(-1, Cout)           # (ky,kx,c) x Cout
    return _finalize_prep([Wm], bias, scale, shift, act, out_dtype)


def _make_convT_prep(W, bias, scale, shift, act, out_dtype):
    """W: (Cin, Cout, 4, 4) PyTorch ConvTranspose2d weight -> 4 parity preps."""
    # equivalent forward-conv kernel: flip spatially, swap cin/cout
    W_eq = jnp.flip(W, axis=(2, 3)).transpose(1, 0, 2, 3)    # (Cout, Cin, 4, 4)
    Cout = W_eq.shape[0]
    Wms = []
    for ys in (0, 1):            # (even-y, odd-y) output parity
        for xs in (0, 1):        # (even-x, odd-x) output parity
            Wsub = W_eq[:, :, ys::2, xs::2]                  # (Cout, Cin, 2, 2)
            Wms.append(Wsub.transpose(2, 3, 1, 0).reshape(-1, Cout))
    return _finalize_prep(Wms, bias, scale, shift, act, out_dtype)


def fused_matmul(patches, prep):
    """act(patches @ W_scaled + shift) per group.  patches: (G, M, K) bf16."""
    G, M, K = patches.shape
    Gw, Kp, Np = prep["wp"].shape
    assert G == Gw
    TK, TN = prep["TK"], prep["TN"]
    TM = min(512, _round_up(M, 16))
    Mp = _round_up(M, TM)
    # On 2-TC chips make sure the parallel grid has >=2 points (megacore).
    if _TC_PER_CHIP >= 2 and G * (Mp // TM) * (Np // TN) < 2 and TM >= 64:
        TM //= 2
    if Mp != M or Kp != K:
        patches = jnp.pad(patches, ((0, 0), (0, Mp - M), (0, Kp - K)))
    patches = patches.astype(jnp.bfloat16)

    out = pl.pallas_call(
        functools.partial(_fused_matmul_kernel, act=prep["act"]),
        out_shape=jax.ShapeDtypeStruct((G, Mp, Np), prep["out_dtype"]),
        grid_spec=pltpu.PrefetchScalarGridSpec(
            num_scalar_prefetch=0,
            grid=(G, Mp // TM, Np // TN, Kp // TK),
            in_specs=[
                pl.BlockSpec((None, TM, TK), lambda g, i, j, k: (g, i, k)),
                pl.BlockSpec((None, TK, TN), lambda g, i, j, k: (g, k, j)),
                pl.BlockSpec((None, 1, TN), lambda g, i, j, k: (g, 0, j)),
            ],
            out_specs=pl.BlockSpec((None, TM, TN), lambda g, i, j, k: (g, i, j)),
            scratch_shapes=[pltpu.VMEM((TM, TN), jnp.float32)],
        ),
        compiler_params=pltpu.CompilerParams(
            dimension_semantics=("parallel", "parallel", "parallel", "arbitrary")),
    )(patches, prep["wp"], prep["shift"])
    return out[:, :M, :prep["N"]]


# ------------------------------ JAX glue ---------------------------------- #
def _extract_patches(x, kernel, stride, pad):
    """x: (N,H,W,C) -> ((N*Ho*Wo, k*k*C), Ho, Wo); feature order (ky, kx, c).

    pad = ((pad_top, pad_bottom), (pad_left, pad_right))."""
    (pt, pb), (pl_, pr) = pad
    if pt or pb or pl_ or pr:
        x = jnp.pad(x, ((0, 0), (pt, pb), (pl_, pr), (0, 0)))
    N, Hp, Wp, C = x.shape
    Ho = (Hp - kernel) // stride + 1
    Wo = (Wp - kernel) // stride + 1
    cols = []
    for ky in range(kernel):
        for kx in range(kernel):
            cols.append(x[:, ky:ky + stride * Ho:stride,
                          kx:kx + stride * Wo:stride, :])
    p = jnp.stack(cols, axis=3)                              # (N, Ho, Wo, k*k, C)
    p = p.reshape(N * Ho * Wo, kernel * kernel * C)
    return p, Ho, Wo


def conv2d_block(x, prep):
    """Conv2d(k=4, s=2, pad=1) + folded BN + activation.  NHWC in / NHWC out."""
    B = x.shape[0]
    patches, Ho, Wo = _extract_patches(x, kernel=4, stride=2, pad=((1, 1), (1, 1)))
    y = fused_matmul(patches[None], prep)[0]                 # (B*Ho*Wo, Cout)
    return y.reshape(B, Ho, Wo, prep["N"])


# padding per output parity (ee, eo, oe, oo): even needs one leading pad,
# odd needs one trailing pad (per spatial axis).
_TPARITY_PADS = (((1, 0), (1, 0)), ((1, 0), (0, 1)),
                 ((0, 1), (1, 0)), ((0, 1), (0, 1)))


def conv_transpose2d_block(x, prep):
    """ConvTranspose2d(k=4, s=2, pad=1) + folded BN + activation (NHWC).

    4-phase sub-pixel decomposition: one 2x2 stride-1 conv per output parity,
    all four run in a SINGLE pallas_call (leading grid axis), results
    interleaved into the (2H, 2W) output."""
    B, H, W, _ = x.shape
    Cout = prep["N"]
    patch_list = [_extract_patches(x, kernel=2, stride=1, pad=pad)[0]
                  for pad in _TPARITY_PADS]
    patches = jnp.stack(patch_list, axis=0)                  # (4, B*H*W, 4*Cin)
    y = fused_matmul(patches, prep)                          # (4, B*H*W, Cout)
    y = y.reshape(4, B, H, W, Cout)
    row_e = jnp.stack([y[0], y[1]], axis=3).reshape(B, H, 2 * W, Cout)
    row_o = jnp.stack([y[2], y[3]], axis=3).reshape(B, H, 2 * W, Cout)
    return jnp.stack([row_e, row_o], axis=2).reshape(B, 2 * H, 2 * W, Cout)


# ------------------------------ Generator --------------------------------- #
class GeneratorSigmoidPallas:
    def __init__(self, key, enc_dim=8, enc_layers=3, dec_dim=8, dec_layers=3,
                 n_attrs=1, shortcut_layers=1, inject_layers=1,
                 img_size=16, dim_per_attr=5):
        self.shortcut_layers = min(shortcut_layers, dec_layers - 1)
        self.inject_layers = min(inject_layers, dec_layers - 1)
        self.f_size = img_size // 2 ** enc_layers
        self.dim_per_attr = dim_per_attr
        self.n_attrs = n_attrs

        keys = iter(jax.random.split(key, 256))

        def raw_params(cin, cout, transpose, norm):
            wshape = (cin, cout, 4, 4) if transpose else (cout, cin, 4, 4)
            W = 0.1 * jax.random.normal(next(keys), wshape, jnp.float32)
            b = 0.1 * jax.random.normal(next(keys), (cout,), jnp.float32)
            if norm:  # batchnorm (eval mode), folded into per-channel scale/shift
                gamma = 1.0 + 0.1 * jax.random.normal(next(keys), (cout,), jnp.float32)
                beta = 0.1 * jax.random.normal(next(keys), (cout,), jnp.float32)
                scale = gamma / jnp.sqrt(1.0 + BN_EPS)
                shift = beta
            else:
                scale = jnp.ones((cout,), jnp.float32)
                shift = jnp.zeros((cout,), jnp.float32)
            return W, b, scale, shift

        # ---- encoder: Conv2d(4,4,s=2,p=1) + BN + lrelu (weight prep hoisted) ----
        self.enc_preps = []
        n_in = 3
        for i in range(enc_layers):
            n_out = min(enc_dim * 2 ** i, MAX_DIM)
            W, b, scale, shift = raw_params(n_in, n_out, transpose=False, norm=True)
            self.enc_preps.append(
                _make_conv_prep(W, b, scale, shift, "lrelu", jnp.bfloat16))
            n_in = n_out

        # ---- decoder: ConvTranspose2d(4,4,s=2,p=1), 4 parity sub-kernels each ----
        self.dec_preps = []
        dim_attrs = n_attrs * dim_per_attr
        n_in = n_in + dim_attrs
        for i in range(dec_layers):
            last = i == dec_layers - 1
            n_out = 3 if last else min(dec_dim * 2 ** (dec_layers - i - 1), MAX_DIM)
            act = "sigmoid" if last else "relu"
            out_dtype = jnp.float32 if last else jnp.bfloat16
            W, b, scale, shift = raw_params(n_in, n_out, transpose=True, norm=not last)
            self.dec_preps.append(
                _make_convT_prep(W, b, scale, shift, act, out_dtype))
            if not last:
                n_in = n_out
                n_in = n_in + n_in // 2 if self.shortcut_layers > i else n_in
                n_in = n_in + dim_attrs if self.inject_layers > i else n_in

        # jit the whole forward paths once (weight prep is already hoisted above)
        self._encdec_jit = jax.jit(
            lambda x, a: self._decode_impl(self._encode_impl(x), a))
        self._enc_external_jit = jax.jit(
            lambda x: [jnp.transpose(z, (0, 3, 1, 2)).astype(jnp.float32)
                       for z in self._encode_impl(x)])
        self._dec_external_jit = jax.jit(
            lambda zs, a: self._decode_impl(
                [jnp.transpose(z, (0, 2, 3, 1)).astype(jnp.bfloat16) for z in zs], a))

    # -------------------------- forward impls ----------------------------- #
    def _attr_tile(self, a, size):
        B = a.shape[0]
        return jnp.tile(a.reshape(B, 1, 1, -1).astype(jnp.bfloat16),
                        (1, size, size, self.dim_per_attr))

    def _encode_impl(self, x_nchw):
        # NCHW (like PyTorch) -> NHWC bf16 once at the boundary.
        z = jnp.transpose(x_nchw, (0, 2, 3, 1)).astype(jnp.bfloat16)
        zs = []
        for prep in self.enc_preps:
            z = conv2d_block(z, prep)
            zs.append(z)
        return zs

    def _decode_impl(self, zs, a):
        z = jnp.concatenate([zs[-1], self._attr_tile(a, self.f_size)], axis=-1)
        n_dec = len(self.dec_preps)
        for i, prep in enumerate(self.dec_preps):
            z = conv_transpose2d_block(z, prep)
            if self.shortcut_layers > i:
                z = jnp.concatenate([z, zs[n_dec - 2 - i]], axis=-1)
            if self.inject_layers > i:
                s = self.f_size * 2 ** (i + 1)
                z = jnp.concatenate([z, self._attr_tile(a, s)], axis=-1)
        # NHWC -> NCHW once at the output boundary (last layer emitted f32).
        return jnp.transpose(z, (0, 3, 1, 2))

    def __call__(self, x, a=None, mode="enc-dec"):
        if mode == "enc-dec":
            assert a is not None, "No given attribute."
            return self._encdec_jit(x, a)
        if mode == "enc":
            return self._enc_external_jit(x)
        if mode == "dec":
            assert a is not None, "No given attribute."
            return self._dec_external_jit(x, a)
        raise Exception("Unrecognized mode: " + mode)


if __name__ == "__main__":
    key = jax.random.PRNGKey(0)
    kx, ka, kp = jax.random.split(key, 3)

    # small config: 3 enc / 3 dec layers, img 16x16, batch 2, 1 attribute
    gen = GeneratorSigmoidPallas(kp, enc_dim=8, enc_layers=3, dec_dim=8, dec_layers=3,
                                 n_attrs=1, shortcut_layers=1, inject_layers=1,
                                 img_size=16, dim_per_attr=5)

    x = jax.random.normal(kx, (2, 3, 16, 16), jnp.float32)   # NCHW, like PyTorch
    a = jax.random.normal(ka, (2, 1), jnp.float32)

    out = gen(x, a, mode="enc-dec")
    out = jax.block_until_ready(out)

    assert out.shape == (2, 3, 16, 16), out.shape
    assert bool(jnp.all(jnp.isfinite(out)))
    assert bool(jnp.all(out >= 0.0)) and bool(jnp.all(out <= 1.0))  # sigmoid output
    print("KERNEL_OK")
</pallas_src>

<mosaic_0001>
module attributes {stable_mosaic.version = 11 : i64} {
  func.func @_fused_matmul_kernel(%arg0: i32, %arg1: i32, %arg2: i32, %arg3: i32, %arg4: memref<1x128x128xbf16, #tpu.memory_space<vmem>>, %arg5: memref<1x128x128xbf16, #tpu.memory_space<vmem>>, %arg6: memref<1x1x128xf32, #tpu.memory_space<vmem>>, %arg7: memref<1x128x128xbf16, #tpu.memory_space<vmem>>, %arg8: memref<128x128xf32, #tpu.memory_space<vmem>>) attributes {dimension_semantics = [#tpu.dimension_semantics<parallel>, #tpu.dimension_semantics<parallel>, #tpu.dimension_semantics<parallel>, #tpu.dimension_semantics<arbitrary>], iteration_bounds = array<i64: 1, 1, 1, 1>, scalar_prefetch = 0 : i64, scratch_operands = 1 : i64, tpu.core_type = #tpu.core_type<tc>, window_params = [{transform_indices = @transform_0, window_bounds = array<i64: 1, 128, 128>}, {transform_indices = @transform_1, window_bounds = array<i64: 1, 128, 128>}, {transform_indices = @transform_2, window_bounds = array<i64: 1, 1, 128>}, {transform_indices = @transform_3, window_bounds = array<i64: 1, 128, 128>}]} {
    %c0_i32 = arith.constant 0 : i32
    %0 = arith.cmpi eq, %arg3, %c0_i32 : i32
    %1 = arith.extui %0 : i1 to i32
    %c0_i32_0 = arith.constant 0 : i32
    %2 = arith.cmpi ne, %1, %c0_i32_0 : i32
    scf.if %2 {
      %cst_12 = arith.constant 0.000000e+00 : f32
      %14 = vector.broadcast %cst_12 : f32 to vector<128x128xf32>
      %c0_13 = arith.constant 0 : index
      %c0_14 = arith.constant 0 : index
      %15 = vector.load %arg8[%c0_13, %c0_14] : memref<128x128xf32, #tpu.memory_space<vmem>>, vector<128x128xf32>
      tpu.vector_store %arg8[%c0_13, %c0_14], %14 {strides = array<i32>} : memref<128x128xf32, #tpu.memory_space<vmem>>, vector<128x128xf32>,
    } else {
    }
    %c0 = arith.constant 0 : index
    %c0_1 = arith.constant 0 : index
    %3 = vector.load %arg8[%c0, %c0_1] : memref<128x128xf32, #tpu.memory_space<vmem>>, vector<128x128xf32>
    %c0_2 = arith.constant 0 : index
    %c0_3 = arith.constant 0 : index
    %c0_4 = arith.constant 0 : index
    %4 = vector.load %arg4[%c0_2, %c0_3, %c0_4] : memref<1x128x128xbf16, #tpu.memory_space<vmem>>, vector<1x128x128xbf16>
    %5 = vector.shape_cast %4 : vector<1x128x128xbf16> to vector<128x128xbf16>
    %c0_5 = arith.constant 0 : index
    %c0_6 = arith.constant 0 : index
    %c0_7 = arith.constant 0 : index
    %6 = vector.load %arg5[%c0_5, %c0_6, %c0_7] : memref<1x128x128xbf16, #tpu.memory_space<vmem>>, vector<1x128x128xbf16>
    %7 = vector.shape_cast %6 : vector<1x128x128xbf16> to vector<128x128xbf16>
    %cst = arith.constant dense<0.000000e+00> : vector<128x128xf32>
    %8 = tpu.matmul %5, %7, %cst {dimension_numbers = #tpu.dot_dimension_numbers<[1], [0], [0], [1], [0, 0, 1, 1], [], []>} : vector<128x128xbf16>, vector<128x128xbf16>, vector<128x128xf32> -> vector<128x128xf32>
    %9 = arith.addf %3, %8 : vector<128x128xf32>
    %c0_8 = arith.constant 0 : index
    %c0_9 = arith.constant 0 : index
    %10 = vector.load %arg8[%c0_8, %c0_9] : memref<128x128xf32, #tpu.memory_space<vmem>>, vector<128x128xf32>
    tpu.vector_store %arg8[%c0_8, %c0_9], %9 {strides = array<i32>} : memref<128x128xf32, #tpu.memory_space<vmem>>, vector<128x128xf32>,
    %c0_i32_10 = arith.constant 0 : i32
    %11 = arith.cmpi eq, %arg3, %c0_i32_10 : i32
    %12 = arith.extui %11 : i1 to i32
    %c0_i32_11 = arith.constant 0 : i32
    %13 = arith.cmpi ne, %12, %c0_i32_11 : i32
    scf.if %13 {
      %c0_12 = arith.constant 0 : index
      %c0_13 = arith.constant 0 : index
      %14 = vector.load %arg8[%c0_12, %c0_13] : memref<128x128xf32, #tpu.memory_space<vmem>>, vector<128x128xf32>
      %c0_14 = arith.constant 0 : index
      %c0_15 = arith.constant 0 : index
      %c0_16 = arith.constant 0 : index
      %15 = vector.load %arg6[%c0_14, %c0_15, %c0_16] : memref<1x1x128xf32, #tpu.memory_space<vmem>>, vector<1x1x128xf32>
      %16 = vector.shape_cast %15 : vector<1x1x128xf32> to vector<1x128xf32>
      %17 = vector.broadcast %16 : vector<1x128xf32> to vector<128x128xf32>
      %18 = arith.addf %14, %17 : vector<128x128xf32>
      %cst_17 = arith.constant 0.000000e+00 : f32
      %19 = vector.broadcast %cst_17 : f32 to vector<128x128xf32>
      %20 = arith.cmpf oge, %18, %19 : vector<128x128xf32>
      %cst_18 = arith.constant 0.00999999977 : f32
      %21 = vector.broadcast %cst_18 : f32 to vector<128x128xf32>
      %22 = arith.mulf %21, %18 : vector<128x128xf32>
      %23 = arith.select %20, %18, %22 : vector<128x128xi1>, vector<128x128xf32>
      %24 = arith.truncf %23 : vector<128x128xf32> to vector<128x128xbf16>
      %c0_19 = arith.constant 0 : index
      %c0_20 = arith.constant 0 : index
      %c0_21 = arith.constant 0 : index
      %25 = vector.load %arg7[%c0_19, %c0_20, %c0_21] : memref<1x128x128xbf16, #tpu.memory_space<vmem>>, vector<1x128x128xbf16>
      %26 = vector.shape_cast %25 : vector<1x128x128xbf16> to vector<128x128xbf16>
      %27 = vector.shape_cast %24 : vector<128x128xbf16> to vector<1x128x128xbf16>
      tpu.vector_store %arg7[%c0_19, %c0_20, %c0_21], %27 {strides = array<i32>} : memref<1x128x128xbf16, #tpu.memory_space<vmem>>, vector<1x128x128xbf16>,
    } else {
    }
    return
  }
  func.func @transform_0(%arg0: i32, %arg1: i32, %arg2: i32, %arg3: i32) -> (i32, i32, i32) {
    %c0_i32 = arith.constant 0 : i32
    return %arg0, %arg1, %arg3 : i32, i32, i32
  }
  func.func @transform_1(%arg0: i32, %arg1: i32, %arg2: i32, %arg3: i32) -> (i32, i32, i32) {
    %c0_i32 = arith.constant 0 : i32
    return %arg0, %arg3, %arg2 : i32, i32, i32
  }
  func.func @transform_2(%arg0: i32, %arg1: i32, %arg2: i32, %arg3: i32) -> (i32, i32, i32) {
    %c0_i32 = arith.constant 0 : i32
    %c0_i32_0 = arith.constant 0 : i32
    return %arg0, %c0_i32, %arg2 : i32, i32, i32
  }
  func.func @transform_3(%arg0: i32, %arg1: i32, %arg2: i32, %arg3: i32) -> (i32, i32, i32) {
    %c0_i32 = arith.constant 0 : i32
    return %arg0, %arg1, %arg2 : i32, i32, i32
  }
}

module attributes {stable_mosaic.version = 11 : i64} {
  func.func @_fused_matmul_kernel(%arg0: i32, %arg1: i32, %arg2: i32, %arg3: i32, %arg4: memref<1x32x128xbf16, #tpu.memory_space<vmem>>, %arg5: memref<1x128x128xbf16, #tpu.memory_space<vmem>>, %arg6: memref<1x1x128xf32, #tpu.memory_space<vmem>>, %arg7: memref<1x32x128xbf16, #tpu.memory_space<vmem>>, %arg8: memref<32x128xf32, #tpu.memory_space<vmem>>) attributes {dimension_semantics = [#tpu.dimension_semantics<parallel>, #tpu.dimension_semantics<parallel>, #tpu.dimension_semantics<parallel>, #tpu.dimension_semantics<arbitrary>], iteration_bounds = array<i64: 1, 1, 1, 1>, scalar_prefetch = 0 : i64, scratch_operands = 1 : i64, tpu.core_type = #tpu.core_type<tc>, window_params = [{transform_indices = @transform_0, window_bounds = array<i64: 1, 32, 128>}, {transform_indices = @transform_1, window_bounds = array<i64: 1, 128, 128>}, {transform_indices = @transform_2, window_bounds = array<i64: 1, 1, 128>}, {transform_indices = @transform_3, window_bounds = array<i64: 1, 32, 128>}]} {
    %c0_i32 = arith.constant 0 : i32
    %0 = arith.cmpi eq, %arg3, %c0_i32 : i32
    %1 = arith.extui %0 : i1 to i32
    %c0_i32_0 = arith.constant 0 : i32
    %2 = arith.cmpi ne, %1, %c0_i32_0 : i32
    scf.if %2 {
      %cst_12 = arith.constant 0.000000e+00 : f32
      %14 = vector.broadcast %cst_12 : f32 to vector<32x128xf32>
      %c0_13 = arith.constant 0 : index
      %c0_14 = arith.constant 0 : index
      %15 = vector.load %arg8[%c0_13, %c0_14] : memref<32x128xf32, #tpu.memory_space<vmem>>, vector<32x128xf32>
      tpu.vector_store %arg8[%c0_13, %c0_14], %14 {strides = array<i32>} : memref<32x128xf32, #tpu.memory_space<vmem>>, vector<32x128xf32>,
    } else {
    }
    %c0 = arith.constant 0 : index
    %c0_1 = arith.constant 0 : index
    %3 = vector.load %arg8[%c0, %c0_1] : memref<32x128xf32, #tpu.memory_space<vmem>>, vector<32x128xf32>
    %c0_2 = arith.constant 0 : index
    %c0_3 = arith.constant 0 : index
    %c0_4 = arith.constant 0 : index
    %4 = vector.load %arg4[%c0_2, %c0_3, %c0_4] : memref<1x32x128xbf16, #tpu.memory_space<vmem>>, vector<1x32x128xbf16>
    %5 = vector.shape_cast %4 : vector<1x32x128xbf16> to vector<32x128xbf16>
    %c0_5 = arith.constant 0 : index
    %c0_6 = arith.constant 0 : index
    %c0_7 = arith.constant 0 : index
    %6 = vector.load %arg5[%c0_5, %c0_6, %c0_7] : memref<1x128x128xbf16, #tpu.memory_space<vmem>>, vector<1x128x128xbf16>
    %7 = vector.shape_cast %6 : vector<1x128x128xbf16> to vector<128x128xbf16>
    %cst = arith.constant dense<0.000000e+00> : vector<32x128xf32>
    %8 = tpu.matmul %5, %7, %cst {dimension_numbers = #tpu.dot_dimension_numbers<[1], [0], [0], [1], [0, 0, 1, 1], [], []>} : vector<32x128xbf16>, vector<128x128xbf16>, vector<32x128xf32> -> vector<32x128xf32>
    %9 = arith.addf %3, %8 : vector<32x128xf32>
    %c0_8 = arith.constant 0 : index
    %c0_9 = arith.constant 0 : index
    %10 = vector.load %arg8[%c0_8, %c0_9] : memref<32x128xf32, #tpu.memory_space<vmem>>, vector<32x128xf32>
    tpu.vector_store %arg8[%c0_8, %c0_9], %9 {strides = array<i32>} : memref<32x128xf32, #tpu.memory_space<vmem>>, vector<32x128xf32>,
    %c0_i32_10 = arith.constant 0 : i32
    %11 = arith.cmpi eq, %arg3, %c0_i32_10 : i32
    %12 = arith.extui %11 : i1 to i32
    %c0_i32_11 = arith.constant 0 : i32
    %13 = arith.cmpi ne, %12, %c0_i32_11 : i32
    scf.if %13 {
      %c0_12 = arith.constant 0 : index
      %c0_13 = arith.constant 0 : index
      %14 = vector.load %arg8[%c0_12, %c0_13] : memref<32x128xf32, #tpu.memory_space<vmem>>, vector<32x128xf32>
      %c0_14 = arith.constant 0 : index
      %c0_15 = arith.constant 0 : index
      %c0_16 = arith.constant 0 : index
      %15 = vector.load %arg6[%c0_14, %c0_15, %c0_16] : memref<1x1x128xf32, #tpu.memory_space<vmem>>, vector<1x1x128xf32>
      %16 = vector.shape_cast %15 : vector<1x1x128xf32> to vector<1x128xf32>
      %17 = vector.broadcast %16 : vector<1x128xf32> to vector<32x128xf32>
      %18 = arith.addf %14, %17 : vector<32x128xf32>
      %cst_17 = arith.constant 0.000000e+00 : f32
      %19 = vector.broadcast %cst_17 : f32 to vector<32x128xf32>
      %20 = arith.cmpf oge, %18, %19 : vector<32x128xf32>
      %cst_18 = arith.constant 0.00999999977 : f32
      %21 = vector.broadcast %cst_18 : f32 to vector<32x128xf32>
      %22 = arith.mulf %21, %18 : vector<32x128xf32>
      %23 = arith.select %20, %18, %22 : vector<32x128xi1>, vector<32x128xf32>
      %24 = arith.truncf %23 : vector<32x128xf32> to vector<32x128xbf16>
      %c0_19 = arith.constant 0 : index
      %c0_20 = arith.constant 0 : index
      %c0_21 = arith.constant 0 : index
      %25 = vector.load %arg7[%c0_19, %c0_20, %c0_21] : memref<1x32x128xbf16, #tpu.memory_space<vmem>>, vector<1x32x128xbf16>
      %26 = vector.shape_cast %25 : vector<1x32x128xbf16> to vector<32x128xbf16>
      %27 = vector.shape_cast %24 : vector<32x128xbf16> to vector<1x32x128xbf16>
      tpu.vector_store %arg7[%c0_19, %c0_20, %c0_21], %27 {strides = array<i32>} : memref<1x32x128xbf16, #tpu.memory_space<vmem>>, vector<1x32x128xbf16>,
    } else {
    }
    return
  }
  func.func @transform_0(%arg0: i32, %arg1: i32, %arg2: i32, %arg3: i32) -> (i32, i32, i32) {
    %c0_i32 = arith.constant 0 : i32
    return %arg0, %arg1, %arg3 : i32, i32, i32
  }
  func.func @transform_1(%arg0: i32, %arg1: i32, %arg2: i32, %arg3: i32) -> (i32, i32, i32) {
    %c0_i32 = arith.constant 0 : i32
    return %arg0, %arg3, %arg2 : i32, i32, i32
  }
  func.func @transform_2(%arg0: i32, %arg1: i32, %arg2: i32, %arg3: i32) -> (i32, i32, i32) {
    %c0_i32 = arith.constant 0 : i32
    %c0_i32_0 = arith.constant 0 : i32
    return %arg0, %c0_i32, %arg2 : i32, i32, i32
  }
  func.func @transform_3(%arg0: i32, %arg1: i32, %arg2: i32, %arg3: i32) -> (i32, i32, i32) {
    %c0_i32 = arith.constant 0 : i32
    return %arg0, %arg1, %arg2 : i32, i32, i32
  }
}

module attributes {stable_mosaic.version = 11 : i64} {
  func.func @_fused_matmul_kernel(%arg0: i32, %arg1: i32, %arg2: i32, %arg3: i32, %arg4: memref<1x16x256xbf16, #tpu.memory_space<vmem>>, %arg5: memref<1x256x128xbf16, #tpu.memory_space<vmem>>, %arg6: memref<1x1x128xf32, #tpu.memory_space<vmem>>, %arg7: memref<1x16x128xbf16, #tpu.memory_space<vmem>>, %arg8: memref<16x128xf32, #tpu.memory_space<vmem>>) attributes {dimension_semantics = [#tpu.dimension_semantics<parallel>, #tpu.dimension_semantics<parallel>, #tpu.dimension_semantics<parallel>, #tpu.dimension_semantics<arbitrary>], iteration_bounds = array<i64: 1, 1, 1, 1>, scalar_prefetch = 0 : i64, scratch_operands = 1 : i64, tpu.core_type = #tpu.core_type<tc>, window_params = [{transform_indices = @transform_0, window_bounds = array<i64: 1, 16, 256>}, {transform_indices = @transform_1, window_bounds = array<i64: 1, 256, 128>}, {transform_indices = @transform_2, window_bounds = array<i64: 1, 1, 128>}, {transform_indices = @transform_3, window_bounds = array<i64: 1, 16, 128>}]} {
    %c0_i32 = arith.constant 0 : i32
    %0 = arith.cmpi eq, %arg3, %c0_i32 : i32
    %1 = arith.extui %0 : i1 to i32
    %c0_i32_0 = arith.constant 0 : i32
    %2 = arith.cmpi ne, %1, %c0_i32_0 : i32
    scf.if %2 {
      %cst_12 = arith.constant 0.000000e+00 : f32
      %14 = vector.broadcast %cst_12 : f32 to vector<16x128xf32>
      %c0_13 = arith.constant 0 : index
      %c0_14 = arith.constant 0 : index
      %15 = vector.load %arg8[%c0_13, %c0_14] : memref<16x128xf32, #tpu.memory_space<vmem>>, vector<16x128xf32>
      tpu.vector_store %arg8[%c0_13, %c0_14], %14 {strides = array<i32>} : memref<16x128xf32, #tpu.memory_space<vmem>>, vector<16x128xf32>,
    } else {
    }
    %c0 = arith.constant 0 : index
    %c0_1 = arith.constant 0 : index
    %3 = vector.load %arg8[%c0, %c0_1] : memref<16x128xf32, #tpu.memory_space<vmem>>, vector<16x128xf32>
    %c0_2 = arith.constant 0 : index
    %c0_3 = arith.constant 0 : index
    %c0_4 = arith.constant 0 : index
    %4 = vector.load %arg4[%c0_2, %c0_3, %c0_4] : memref<1x16x256xbf16, #tpu.memory_space<vmem>>, vector<1x16x256xbf16>
    %5 = vector.shape_cast %4 : vector<1x16x256xbf16> to vector<16x256xbf16>
    %c0_5 = arith.constant 0 : index
    %c0_6 = arith.constant 0 : index
    %c0_7 = arith.constant 0 : index
    %6 = vector.load %arg5[%c0_5, %c0_6, %c0_7] : memref<1x256x128xbf16, #tpu.memory_space<vmem>>, vector<1x256x128xbf16>
    %7 = vector.shape_cast %6 : vector<1x256x128xbf16> to vector<256x128xbf16>
    %cst = arith.constant dense<0.000000e+00> : vector<16x128xf32>
    %8 = tpu.matmul %5, %7, %cst {dimension_numbers = #tpu.dot_dimension_numbers<[1], [0], [0], [1], [0, 0, 1, 1], [], []>} : vector<16x256xbf16>, vector<256x128xbf16>, vector<16x128xf32> -> vector<16x128xf32>
    %9 = arith.addf %3, %8 : vector<16x128xf32>
    %c0_8 = arith.constant 0 : index
    %c0_9 = arith.constant 0 : index
    %10 = vector.load %arg8[%c0_8, %c0_9] : memref<16x128xf32, #tpu.memory_space<vmem>>, vector<16x128xf32>
    tpu.vector_store %arg8[%c0_8, %c0_9], %9 {strides = array<i32>} : memref<16x128xf32, #tpu.memory_space<vmem>>, vector<16x128xf32>,
    %c0_i32_10 = arith.constant 0 : i32
    %11 = arith.cmpi eq, %arg3, %c0_i32_10 : i32
    %12 = arith.extui %11 : i1 to i32
    %c0_i32_11 = arith.constant 0 : i32
    %13 = arith.cmpi ne, %12, %c0_i32_11 : i32
    scf.if %13 {
      %c0_12 = arith.constant 0 : index
      %c0_13 = arith.constant 0 : index
      %14 = vector.load %arg8[%c0_12, %c0_13] : memref<16x128xf32, #tpu.memory_space<vmem>>, vector<16x128xf32>
      %c0_14 = arith.constant 0 : index
      %c0_15 = arith.constant 0 : index
      %c0_16 = arith.constant 0 : index
      %15 = vector.load %arg6[%c0_14, %c0_15, %c0_16] : memref<1x1x128xf32, #tpu.memory_space<vmem>>, vector<1x1x128xf32>
      %16 = vector.shape_cast %15 : vector<1x1x128xf32> to vector<1x128xf32>
      %17 = vector.broadcast %16 : vector<1x128xf32> to vector<16x128xf32>
      %18 = arith.addf %14, %17 : vector<16x128xf32>
      %cst_17 = arith.constant 0.000000e+00 : f32
      %19 = vector.broadcast %cst_17 : f32 to vector<16x128xf32>
      %20 = arith.cmpf oge, %18, %19 : vector<16x128xf32>
      %cst_18 = arith.constant 0.00999999977 : f32
      %21 = vector.broadcast %cst_18 : f32 to vector<16x128xf32>
      %22 = arith.mulf %21, %18 : vector<16x128xf32>
      %23 = arith.select %20, %18, %22 : vector<16x128xi1>, vector<16x128xf32>
      %24 = arith.truncf %23 : vector<16x128xf32> to vector<16x128xbf16>
      %c0_19 = arith.constant 0 : index
      %c0_20 = arith.constant 0 : index
      %c0_21 = arith.constant 0 : index
      %25 = vector.load %arg7[%c0_19, %c0_20, %c0_21] : memref<1x16x128xbf16, #tpu.memory_space<vmem>>, vector<1x16x128xbf16>
      %26 = vector.shape_cast %25 : vector<1x16x128xbf16> to vector<16x128xbf16>
      %27 = vector.shape_cast %24 : vector<16x128xbf16> to vector<1x16x128xbf16>
      tpu.vector_store %arg7[%c0_19, %c0_20, %c0_21], %27 {strides = array<i32>} : memref<1x16x128xbf16, #tpu.memory_space<vmem>>, vector<1x16x128xbf16>,
    } else {
    }
    return
  }
  func.func @transform_0(%arg0: i32, %arg1: i32, %arg2: i32, %arg3: i32) -> (i32, i32, i32) {
    %c0_i32 = arith.constant 0 : i32
    return %arg0, %arg1, %arg3 : i32, i32, i32
  }
  func.func @transform_1(%arg0: i32, %arg1: i32, %arg2: i32, %arg3: i32) -> (i32, i32, i32) {
    %c0_i32 = arith.constant 0 : i32
    return %arg0, %arg3, %arg2 : i32, i32, i32
  }
  func.func @transform_2(%arg0: i32, %arg1: i32, %arg2: i32, %arg3: i32) -> (i32, i32, i32) {
    %c0_i32 = arith.constant 0 : i32
    %c0_i32_0 = arith.constant 0 : i32
    return %arg0, %c0_i32, %arg2 : i32, i32, i32
  }
  func.func @transform_3(%arg0: i32, %arg1: i32, %arg2: i32, %arg3: i32) -> (i32, i32, i32) {
    %c0_i32 = arith.constant 0 : i32
    return %arg0, %arg1, %arg2 : i32, i32, i32
  }
}

module attributes {stable_mosaic.version = 11 : i64} {
  func.func @_fused_matmul_kernel(%arg0: i32, %arg1: i32, %arg2: i32, %arg3: i32, %arg4: memref<1x16x256xbf16, #tpu.memory_space<vmem>>, %arg5: memref<1x256x128xbf16, #tpu.memory_space<vmem>>, %arg6: memref<1x1x128xf32, #tpu.memory_space<vmem>>, %arg7: memref<1x16x128xbf16, #tpu.memory_space<vmem>>, %arg8: memref<16x128xf32, #tpu.memory_space<vmem>>) attributes {dimension_semantics = [#tpu.dimension_semantics<parallel>, #tpu.dimension_semantics<parallel>, #tpu.dimension_semantics<parallel>, #tpu.dimension_semantics<arbitrary>], iteration_bounds = array<i64: 4, 1, 1, 1>, scalar_prefetch = 0 : i64, scratch_operands = 1 : i64, tpu.core_type = #tpu.core_type<tc>, window_params = [{transform_indices = @transform_0, window_bounds = array<i64: 1, 16, 256>}, {transform_indices = @transform_1, window_bounds = array<i64: 1, 256, 128>}, {transform_indices = @transform_2, window_bounds = array<i64: 1, 1, 128>}, {transform_indices = @transform_3, window_bounds = array<i64: 1, 16, 128>}]} {
    %c0_i32 = arith.constant 0 : i32
    %0 = arith.cmpi eq, %arg3, %c0_i32 : i32
    %1 = arith.extui %0 : i1 to i32
    %c0_i32_0 = arith.constant 0 : i32
    %2 = arith.cmpi ne, %1, %c0_i32_0 : i32
    scf.if %2 {
      %cst_12 = arith.constant 0.000000e+00 : f32
      %14 = vector.broadcast %cst_12 : f32 to vector<16x128xf32>
      %c0_13 = arith.constant 0 : index
      %c0_14 = arith.constant 0 : index
      %15 = vector.load %arg8[%c0_13, %c0_14] : memref<16x128xf32, #tpu.memory_space<vmem>>, vector<16x128xf32>
      tpu.vector_store %arg8[%c0_13, %c0_14], %14 {strides = array<i32>} : memref<16x128xf32, #tpu.memory_space<vmem>>, vector<16x128xf32>,
    } else {
    }
    %c0 = arith.constant 0 : index
    %c0_1 = arith.constant 0 : index
    %3 = vector.load %arg8[%c0, %c0_1] : memref<16x128xf32, #tpu.memory_space<vmem>>, vector<16x128xf32>
    %c0_2 = arith.constant 0 : index
    %c0_3 = arith.constant 0 : index
    %c0_4 = arith.constant 0 : index
    %4 = vector.load %arg4[%c0_2, %c0_3, %c0_4] : memref<1x16x256xbf16, #tpu.memory_space<vmem>>, vector<1x16x256xbf16>
    %5 = vector.shape_cast %4 : vector<1x16x256xbf16> to vector<16x256xbf16>
    %c0_5 = arith.constant 0 : index
    %c0_6 = arith.constant 0 : index
    %c0_7 = arith.constant 0 : index
    %6 = vector.load %arg5[%c0_5, %c0_6, %c0_7] : memref<1x256x128xbf16, #tpu.memory_space<vmem>>, vector<1x256x128xbf16>
    %7 = vector.shape_cast %6 : vector<1x256x128xbf16> to vector<256x128xbf16>
    %cst = arith.constant dense<0.000000e+00> : vector<16x128xf32>
    %8 = tpu.matmul %5, %7, %cst {dimension_numbers = #tpu.dot_dimension_numbers<[1], [0], [0], [1], [0, 0, 1, 1], [], []>} : vector<16x256xbf16>, vector<256x128xbf16>, vector<16x128xf32> -> vector<16x128xf32>
    %9 = arith.addf %3, %8 : vector<16x128xf32>
    %c0_8 = arith.constant 0 : index
    %c0_9 = arith.constant 0 : index
    %10 = vector.load %arg8[%c0_8, %c0_9] : memref<16x128xf32, #tpu.memory_space<vmem>>, vector<16x128xf32>
    tpu.vector_store %arg8[%c0_8, %c0_9], %9 {strides = array<i32>} : memref<16x128xf32, #tpu.memory_space<vmem>>, vector<16x128xf32>,
    %c0_i32_10 = arith.constant 0 : i32
    %11 = arith.cmpi eq, %arg3, %c0_i32_10 : i32
    %12 = arith.extui %11 : i1 to i32
    %c0_i32_11 = arith.constant 0 : i32
    %13 = arith.cmpi ne, %12, %c0_i32_11 : i32
    scf.if %13 {
      %c0_12 = arith.constant 0 : index
      %c0_13 = arith.constant 0 : index
      %14 = vector.load %arg8[%c0_12, %c0_13] : memref<16x128xf32, #tpu.memory_space<vmem>>, vector<16x128xf32>
      %c0_14 = arith.constant 0 : index
      %c0_15 = arith.constant 0 : index
      %c0_16 = arith.constant 0 : index
      %15 = vector.load %arg6[%c0_14, %c0_15, %c0_16] : memref<1x1x128xf32, #tpu.memory_space<vmem>>, vector<1x1x128xf32>
      %16 = vector.shape_cast %15 : vector<1x1x128xf32> to vector<1x128xf32>
      %17 = vector.broadcast %16 : vector<1x128xf32> to vector<16x128xf32>
      %18 = arith.addf %14, %17 : vector<16x128xf32>
      %cst_17 = arith.constant 0.000000e+00 : f32
      %19 = vector.broadcast %cst_17 : f32 to vector<16x128xf32>
      %20 = arith.maximumf %18, %19 : vector<16x128xf32>
      %21 = arith.truncf %20 : vector<16x128xf32> to vector<16x128xbf16>
      %c0_18 = arith.constant 0 : index
      %c0_19 = arith.constant 0 : index
      %c0_20 = arith.constant 0 : index
      %22 = vector.load %arg7[%c0_18, %c0_19, %c0_20] : memref<1x16x128xbf16, #tpu.memory_space<vmem>>, vector<1x16x128xbf16>
      %23 = vector.shape_cast %22 : vector<1x16x128xbf16> to vector<16x128xbf16>
      %24 = vector.shape_cast %21 : vector<16x128xbf16> to vector<1x16x128xbf16>
      tpu.vector_store %arg7[%c0_18, %c0_19, %c0_20], %24 {strides = array<i32>} : memref<1x16x128xbf16, #tpu.memory_space<vmem>>, vector<1x16x128xbf16>,
    } else {
    }
    return
  }
  func.func @transform_0(%arg0: i32, %arg1: i32, %arg2: i32, %arg3: i32) -> (i32, i32, i32) {
    %c0_i32 = arith.constant 0 : i32
    return %arg0, %arg1, %arg3 : i32, i32, i32
  }
  func.func @transform_1(%arg0: i32, %arg1: i32, %arg2: i32, %arg3: i32) -> (i32, i32, i32) {
    %c0_i32 = arith.constant 0 : i32
    return %arg0, %arg3, %arg2 : i32, i32, i32
  }
  func.func @transform_2(%arg0: i32, %arg1: i32, %arg2: i32, %arg3: i32) -> (i32, i32, i32) {
    %c0_i32 = arith.constant 0 : i32
    %c0_i32_0 = arith.constant 0 : i32
    return %arg0, %c0_i32, %arg2 : i32, i32, i32
  }
  func.func @transform_3(%arg0: i32, %arg1: i32, %arg2: i32, %arg3: i32) -> (i32, i32, i32) {
    %c0_i32 = arith.constant 0 : i32
    return %arg0, %arg1, %arg2 : i32, i32, i32
  }
}

module attributes {stable_mosaic.version = 11 : i64} {
  func.func @_fused_matmul_kernel(%arg0: i32, %arg1: i32, %arg2: i32, %arg3: i32, %arg4: memref<1x32x256xbf16, #tpu.memory_space<vmem>>, %arg5: memref<1x256x128xbf16, #tpu.memory_space<vmem>>, %arg6: memref<1x1x128xf32, #tpu.memory_space<vmem>>, %arg7: memref<1x32x128xbf16, #tpu.memory_space<vmem>>, %arg8: memref<32x128xf32, #tpu.memory_space<vmem>>) attributes {dimension_semantics = [#tpu.dimension_semantics<parallel>, #tpu.dimension_semantics<parallel>, #tpu.dimension_semantics<parallel>, #tpu.dimension_semantics<arbitrary>], iteration_bounds = array<i64: 4, 1, 1, 1>, scalar_prefetch = 0 : i64, scratch_operands = 1 : i64, tpu.core_type = #tpu.core_type<tc>, window_params = [{transform_indices = @transform_0, window_bounds = array<i64: 1, 32, 256>}, {transform_indices = @transform_1, window_bounds = array<i64: 1, 256, 128>}, {transform_indices = @transform_2, window_bounds = array<i64: 1, 1, 128>}, {transform_indices = @transform_3, window_bounds = array<i64: 1, 32, 128>}]} {
    %c0_i32 = arith.constant 0 : i32
    %0 = arith.cmpi eq, %arg3, %c0_i32 : i32
    %1 = arith.extui %0 : i1 to i32
    %c0_i32_0 = arith.constant 0 : i32
    %2 = arith.cmpi ne, %1, %c0_i32_0 : i32
    scf.if %2 {
      %cst_12 = arith.constant 0.000000e+00 : f32
      %14 = vector.broadcast %cst_12 : f32 to vector<32x128xf32>
      %c0_13 = arith.constant 0 : index
      %c0_14 = arith.constant 0 : index
      %15 = vector.load %arg8[%c0_13, %c0_14] : memref<32x128xf32, #tpu.memory_space<vmem>>, vector<32x128xf32>
      tpu.vector_store %arg8[%c0_13, %c0_14], %14 {strides = array<i32>} : memref<32x128xf32, #tpu.memory_space<vmem>>, vector<32x128xf32>,
    } else {
    }
    %c0 = arith.constant 0 : index
    %c0_1 = arith.constant 0 : index
    %3 = vector.load %arg8[%c0, %c0_1] : memref<32x128xf32, #tpu.memory_space<vmem>>, vector<32x128xf32>
    %c0_2 = arith.constant 0 : index
    %c0_3 = arith.constant 0 : index
    %c0_4 = arith.constant 0 : index
    %4 = vector.load %arg4[%c0_2, %c0_3, %c0_4] : memref<1x32x256xbf16, #tpu.memory_space<vmem>>, vector<1x32x256xbf16>
    %5 = vector.shape_cast %4 : vector<1x32x256xbf16> to vector<32x256xbf16>
    %c0_5 = arith.constant 0 : index
    %c0_6 = arith.constant 0 : index
    %c0_7 = arith.constant 0 : index
    %6 = vector.load %arg5[%c0_5, %c0_6, %c0_7] : memref<1x256x128xbf16, #tpu.memory_space<vmem>>, vector<1x256x128xbf16>
    %7 = vector.shape_cast %6 : vector<1x256x128xbf16> to vector<256x128xbf16>
    %cst = arith.constant dense<0.000000e+00> : vector<32x128xf32>
    %8 = tpu.matmul %5, %7, %cst {dimension_numbers = #tpu.dot_dimension_numbers<[1], [0], [0], [1], [0, 0, 1, 1], [], []>} : vector<32x256xbf16>, vector<256x128xbf16>, vector<32x128xf32> -> vector<32x128xf32>
    %9 = arith.addf %3, %8 : vector<32x128xf32>
    %c0_8 = arith.constant 0 : index
    %c0_9 = arith.constant 0 : index
    %10 = vector.load %arg8[%c0_8, %c0_9] : memref<32x128xf32, #tpu.memory_space<vmem>>, vector<32x128xf32>
    tpu.vector_store %arg8[%c0_8, %c0_9], %9 {strides = array<i32>} : memref<32x128xf32, #tpu.memory_space<vmem>>, vector<32x128xf32>,
    %c0_i32_10 = arith.constant 0 : i32
    %11 = arith.cmpi eq, %arg3, %c0_i32_10 : i32
    %12 = arith.extui %11 : i1 to i32
    %c0_i32_11 = arith.constant 0 : i32
    %13 = arith.cmpi ne, %12, %c0_i32_11 : i32
    scf.if %13 {
      %c0_12 = arith.constant 0 : index
      %c0_13 = arith.constant 0 : index
      %14 = vector.load %arg8[%c0_12, %c0_13] : memref<32x128xf32, #tpu.memory_space<vmem>>, vector<32x128xf32>
      %c0_14 = arith.constant 0 : index
      %c0_15 = arith.constant 0 : index
      %c0_16 = arith.constant 0 : index
      %15 = vector.load %arg6[%c0_14, %c0_15, %c0_16] : memref<1x1x128xf32, #tpu.memory_space<vmem>>, vector<1x1x128xf32>
      %16 = vector.shape_cast %15 : vector<1x1x128xf32> to vector<1x128xf32>
      %17 = vector.broadcast %16 : vector<1x128xf32> to vector<32x128xf32>
      %18 = arith.addf %14, %17 : vector<32x128xf32>
      %cst_17 = arith.constant 0.000000e+00 : f32
      %19 = vector.broadcast %cst_17 : f32 to vector<32x128xf32>
      %20 = arith.maximumf %18, %19 : vector<32x128xf32>
      %21 = arith.truncf %20 : vector<32x128xf32> to vector<32x128xbf16>
      %c0_18 = arith.constant 0 : index
      %c0_19 = arith.constant 0 : index
      %c0_20 = arith.constant 0 : index
      %22 = vector.load %arg7[%c0_18, %c0_19, %c0_20] : memref<1x32x128xbf16, #tpu.memory_space<vmem>>, vector<1x32x128xbf16>
      %23 = vector.shape_cast %22 : vector<1x32x128xbf16> to vector<32x128xbf16>
      %24 = vector.shape_cast %21 : vector<32x128xbf16> to vector<1x32x128xbf16>
      tpu.vector_store %arg7[%c0_18, %c0_19, %c0_20], %24 {strides = array<i32>} : memref<1x32x128xbf16, #tpu.memory_space<vmem>>, vector<1x32x128xbf16>,
    } else {
    }
    return
  }
  func.func @transform_0(%arg0: i32, %arg1: i32, %arg2: i32, %arg3: i32) -> (i32, i32, i32) {
    %c0_i32 = arith.constant 0 : i32
    return %arg0, %arg1, %arg3 : i32, i32, i32
  }
  func.func @transform_1(%arg0: i32, %arg1: i32, %arg2: i32, %arg3: i32) -> (i32, i32, i32) {
    %c0_i32 = arith.constant 0 : i32
    return %arg0, %arg3, %arg2 : i32, i32, i32
  }
  func.func @transform_2(%arg0: i32, %arg1: i32, %arg2: i32, %arg3: i32) -> (i32, i32, i32) {
    %c0_i32 = arith.constant 0 : i32
    %c0_i32_0 = arith.constant 0 : i32
    return %arg0, %c0_i32, %arg2 : i32, i32, i32
  }
  func.func @transform_3(%arg0: i32, %arg1: i32, %arg2: i32, %arg3: i32) -> (i32, i32, i32) {
    %c0_i32 = arith.constant 0 : i32
    return %arg0, %arg1, %arg2 : i32, i32, i32
  }
}

module attributes {stable_mosaic.version = 11 : i64} {
  func.func @_fused_matmul_kernel(%arg0: i32, %arg1: i32, %arg2: i32, %arg3: i32, %arg4: memref<1x128x128xbf16, #tpu.memory_space<vmem>>, %arg5: memref<1x128x128xbf16, #tpu.memory_space<vmem>>, %arg6: memref<1x1x128xf32, #tpu.memory_space<vmem>>, %arg7: memref<1x128x128xf32, #tpu.memory_space<vmem>>, %arg8: memref<128x128xf32, #tpu.memory_space<vmem>>) attributes {dimension_semantics = [#tpu.dimension_semantics<parallel>, #tpu.dimension_semantics<parallel>, #tpu.dimension_semantics<parallel>, #tpu.dimension_semantics<arbitrary>], iteration_bounds = array<i64: 4, 1, 1, 1>, scalar_prefetch = 0 : i64, scratch_operands = 1 : i64, tpu.core_type = #tpu.core_type<tc>, window_params = [{transform_indices = @transform_0, window_bounds = array<i64: 1, 128, 128>}, {transform_indices = @transform_1, window_bounds = array<i64: 1, 128, 128>}, {transform_indices = @transform_2, window_bounds = array<i64: 1, 1, 128>}, {transform_indices = @transform_3, window_bounds = array<i64: 1, 128, 128>}]} {
    %c0_i32 = arith.constant 0 : i32
    %0 = arith.cmpi eq, %arg3, %c0_i32 : i32
    %1 = arith.extui %0 : i1 to i32
    %c0_i32_0 = arith.constant 0 : i32
    %2 = arith.cmpi ne, %1, %c0_i32_0 : i32
    scf.if %2 {
      %cst_12 = arith.constant 0.000000e+00 : f32
      %14 = vector.broadcast %cst_12 : f32 to vector<128x128xf32>
      %c0_13 = arith.constant 0 : index
      %c0_14 = arith.constant 0 : index
      %15 = vector.load %arg8[%c0_13, %c0_14] : memref<128x128xf32, #tpu.memory_space<vmem>>, vector<128x128xf32>
      tpu.vector_store %arg8[%c0_13, %c0_14], %14 {strides = array<i32>} : memref<128x128xf32, #tpu.memory_space<vmem>>, vector<128x128xf32>,
    } else {
    }
    %c0 = arith.constant 0 : index
    %c0_1 = arith.constant 0 : index
    %3 = vector.load %arg8[%c0, %c0_1] : memref<128x128xf32, #tpu.memory_space<vmem>>, vector<128x128xf32>
    %c0_2 = arith.constant 0 : index
    %c0_3 = arith.constant 0 : index
    %c0_4 = arith.constant 0 : index
    %4 = vector.load %arg4[%c0_2, %c0_3, %c0_4] : memref<1x128x128xbf16, #tpu.memory_space<vmem>>, vector<1x128x128xbf16>
    %5 = vector.shape_cast %4 : vector<1x128x128xbf16> to vector<128x128xbf16>
    %c0_5 = arith.constant 0 : index
    %c0_6 = arith.constant 0 : index
    %c0_7 = arith.constant 0 : index
    %6 = vector.load %arg5[%c0_5, %c0_6, %c0_7] : memref<1x128x128xbf16, #tpu.memory_space<vmem>>, vector<1x128x128xbf16>
    %7 = vector.shape_cast %6 : vector<1x128x128xbf16> to vector<128x128xbf16>
    %cst = arith.constant dense<0.000000e+00> : vector<128x128xf32>
    %8 = tpu.matmul %5, %7, %cst {dimension_numbers = #tpu.dot_dimension_numbers<[1], [0], [0], [1], [0, 0, 1, 1], [], []>} : vector<128x128xbf16>, vector<128x128xbf16>, vector<128x128xf32> -> vector<128x128xf32>
    %9 = arith.addf %3, %8 : vector<128x128xf32>
    %c0_8 = arith.constant 0 : index
    %c0_9 = arith.constant 0 : index
    %10 = vector.load %arg8[%c0_8, %c0_9] : memref<128x128xf32, #tpu.memory_space<vmem>>, vector<128x128xf32>
    tpu.vector_store %arg8[%c0_8, %c0_9], %9 {strides = array<i32>} : memref<128x128xf32, #tpu.memory_space<vmem>>, vector<128x128xf32>,
    %c0_i32_10 = arith.constant 0 : i32
    %11 = arith.cmpi eq, %arg3, %c0_i32_10 : i32
    %12 = arith.extui %11 : i1 to i32
    %c0_i32_11 = arith.constant 0 : i32
    %13 = arith.cmpi ne, %12, %c0_i32_11 : i32
    scf.if %13 {
      %c0_12 = arith.constant 0 : index
      %c0_13 = arith.constant 0 : index
      %14 = vector.load %arg8[%c0_12, %c0_13] : memref<128x128xf32, #tpu.memory_space<vmem>>, vector<128x128xf32>
      %c0_14 = arith.constant 0 : index
      %c0_15 = arith.constant 0 : index
      %c0_16 = arith.constant 0 : index
      %15 = vector.load %arg6[%c0_14, %c0_15, %c0_16] : memref<1x1x128xf32, #tpu.memory_space<vmem>>, vector<1x1x128xf32>
      %16 = vector.shape_cast %15 : vector<1x1x128xf32> to vector<1x128xf32>
      %17 = vector.broadcast %16 : vector<1x128xf32> to vector<128x128xf32>
      %18 = arith.addf %14, %17 : vector<128x128xf32>
      %19 = arith.negf %18 : vector<128x128xf32>
      %20 = math.exp %19 : vector<128x128xf32>
      %cst_17 = arith.constant 1.000000e+00 : f32
      %21 = vector.broadcast %cst_17 : f32 to vector<128x128xf32>
      %22 = arith.addf %21, %20 : vector<128x128xf32>
      %23 = arith.divf %21, %22 : vector<128x128xf32>
      %c0_18 = arith.constant 0 : index
      %c0_19 = arith.constant 0 : index
      %c0_20 = arith.constant 0 : index
      %24 = vector.load %arg7[%c0_18, %c0_19, %c0_20] : memref<1x128x128xf32, #tpu.memory_space<vmem>>, vector<1x128x128xf32>
      %25 = vector.shape_cast %24 : vector<1x128x128xf32> to vector<128x128xf32>
      %26 = vector.shape_cast %23 : vector<128x128xf32> to vector<1x128x128xf32>
      tpu.vector_store %arg7[%c0_18, %c0_19, %c0_20], %26 {strides = array<i32>} : memref<1x128x128xf32, #tpu.memory_space<vmem>>, vector<1x128x128xf32>,
    } else {
    }
    return
  }
  func.func @transform_0(%arg0: i32, %arg1: i32, %arg2: i32, %arg3: i32) -> (i32, i32, i32) {
    %c0_i32 = arith.constant 0 : i32
    return %arg0, %arg1, %arg3 : i32, i32, i32
  }
  func.func @transform_1(%arg0: i32, %arg1: i32, %arg2: i32, %arg3: i32) -> (i32, i32, i32) {
    %c0_i32 = arith.constant 0 : i32
    return %arg0, %arg3, %arg2 : i32, i32, i32
  }
  func.func @transform_2(%arg0: i32, %arg1: i32, %arg2: i32, %arg3: i32) -> (i32, i32, i32) {
    %c0_i32 = arith.constant 0 : i32
    %c0_i32_0 = arith.constant 0 : i32
    return %arg0, %c0_i32, %arg2 : i32, i32, i32
  }
  func.func @transform_3(%arg0: i32, %arg1: i32, %arg2: i32, %arg3: i32) -> (i32, i32, i32) {
    %c0_i32 = arith.constant 0 : i32
    return %arg0, %arg1, %arg2 : i32, i32, i32
  }
}

</mosaic_0001>

<bundles_post_ra>
// kernel: _lambda_.6
= control target key start
LH: loop header
LB: loop body
LE: loop exit
PB: predicated region body
PF: predicated region fallthrough
CT: control target
= control target key end

     0   :  { %s777_s1 = inlined_call_operand.vmem [shape: bf16[1,128,128], index: 1, kind: input, shape index: {}]   ;;  %s778_s0 = inlined_call_operand.vmem [shape: bf16[1,128,128], index: 0, kind: input, shape index: {}]   ;;  %s779_s2 = inlined_call_operand.vmem [shape: f32[1,1,128], index: 2, kind: input, shape index: {}]   ;;  %s780_s3 = inlined_call_operand.vmem [shape: bf16[1,128,128], index: 3, kind: output, shape index: {}]  }
   0x1   :  { %v642_v0 = vld [vmem:[%s777_s1 + $0x38] sm:$0xff]   ;;  %v643_v1 = vld [vmem:[%s777_s1 + $0x30] sm:$0xff]   ;;  %v644_v2 = vld [vmem:[%s777_s1 + $0x28] sm:$0xff]  }
   0x2   :  { %594 = vmatprep.subr.bf16.mxu0 %v642_v0  ;;  %626 = vmatprep.subr.bf16.mxu1 %v642_v0  ;;  %v645_v3 = vld [vmem:[%s777_s1 + $0x20] sm:$0xff]   ;;  %v646_v6 = vld [vmem:[%s777_s1 + $0x18] sm:$0xff]   ;;  %v647_v7 = vld [vmem:[%s777_s1 + $0x10] sm:$0xff]  }
   0x3   :  { %595 = vmatpush3.bf16.msra.mxu0 %v642_v0  ;;  %634 = vmatpush3.bf16.msra.mxu1 %v642_v0  ;;  %v650_v4 = vld [vmem:[%s778_s0] sm:$0xff]   ;;  %v648_v8 = vld [vmem:[%s777_s1 + $0x8] sm:$0xff]   ;;  %v654_v12 = vld [vmem:[%s778_s0 + $0x10] sm:$0xff]  }
   0x4   :  { %596 = vmatprep.subr.bf16.mxu0 %v643_v1  ;;  %627 = vmatprep.subr.bf16.mxu1 %v643_v1  ;;  %v651_v5 = vld [vmem:[%s778_s0 + $0x20] sm:$0xff]   ;;  %v652_v10 = vld [vmem:[%s778_s0 + $0x8] sm:$0xff]   ;;  %v655_v13 = vld [vmem:[%s778_s0 + $0x30] sm:$0xff]  }
   0x5   :  { %610 = vmatprep.mubr.bf16.mxu0 %v650_v4  ;;  %618 = vmatprep.mubr.bf16.mxu1 %v651_v5  ;;  %v649_v9 = vld [vmem:[%s777_s1] sm:$0xff]   ;;  %v653_v11 = vld [vmem:[%s778_s0 + $0x28] sm:$0xff]   ;;  %v656_v14 = vld [vmem:[%s778_s0 + $0x18] sm:$0xff]  }
   0x6   :  { %v657_v15 = vld [vmem:[%s778_s0 + $0x38] sm:$0xff]   ;;  %v729_v16 = vld [vmem:[%s779_s2] ss:$0 sm:$0xff] }
   0x7   :  { %597 = vmatpush3.bf16.msra.mxu0 %v643_v1  ;;  %635 = vmatpush3.bf16.msra.mxu1 %v643_v1 }
   0x8   :  { %598 = vmatprep.subr.bf16.mxu0 %v644_v2  ;;  %628 = vmatprep.subr.bf16.mxu1 %v644_v2 }
   0xb   :  { %599 = vmatpush3.bf16.msra.mxu0 %v644_v2  ;;  %636 = vmatpush3.bf16.msra.mxu1 %v644_v2 }
   0xc   :  { %600 = vmatprep.subr.bf16.mxu0 %v645_v3  ;;  %629 = vmatprep.subr.bf16.mxu1 %v645_v3 }
   0xf   :  { %601 = vmatpush3.bf16.msra.mxu0 %v645_v3  ;;  %637 = vmatpush3.bf16.msra.mxu1 %v645_v3 }
  0x10   :  { %602 = vmatprep.subr.bf16.mxu0 %v646_v6  ;;  %630 = vmatprep.subr.bf16.mxu1 %v646_v6 }
  0x13   :  { %603 = vmatpush3.bf16.msra.mxu0 %v646_v6  ;;  %638 = vmatpush3.bf16.msra.mxu1 %v646_v6 }
  0x14   :  { %604 = vmatprep.subr.bf16.mxu0 %v647_v7  ;;  %631 = vmatprep.subr.bf16.mxu1 %v647_v7 }
  0x17   :  { %605 = vmatpush3.bf16.msra.mxu0 %v647_v7  ;;  %639 = vmatpush3.bf16.msra.mxu1 %v647_v7 }
  0x18   :  { %606 = vmatprep.subr.bf16.mxu0 %v648_v8  ;;  %632 = vmatprep.subr.bf16.mxu1 %v648_v8 }
  0x1b   :  { %607 = vmatpush3.bf16.msra.mxu0 %v648_v8  ;;  %640 = vmatpush3.bf16.msra.mxu1 %v648_v8 }
  0x1c   :  { %608 = vmatprep.subr.bf16.mxu0 %v649_v9  ;;  %633 = vmatprep.subr.bf16.mxu1 %v649_v9 }
  0x1f   :  { %609 = vmatpush3.bf16.msra.mxu0 %v649_v9  ;;  %641 = vmatpush3.bf16.msra.mxu1 %v649_v9 }
  0x22   :  { %611 = vmatmul.mubr.bf16.vlgmr.msra.gmra.mxu0 %v652_v10  ;;  %619 = vmatmul.mubr.bf16.vlgmr.msra.gmra.mxu1 %v653_v11 }
  0x23   :  { %614 = vmatprep.mubr.bf16.mxu0 %v654_v12  ;;  %622 = vmatprep.mubr.bf16.mxu1 %v655_v13 }
  0x2a   :  { %615 = vmatmul.mubr.bf16.gmra.mxu0 %v656_v14  ;;  %623 = vmatmul.mubr.bf16.gmra.mxu1 %v657_v15 }
  0xe2   :  { %v612_v17 = vpop.f32.mrf.mxu0  ;;  %v620_v18 = vpop.f32.mrf.mxu1 }
  0xe3   :  { %v336_v19 = vadd.f32 %v612_v17, %v729_v16  ;;  %v344_v20 = vadd.f32 %v620_v18, %v729_v16 }
  0xe4   :  { %v213_v21 = vpop.f32.mrf.mxu0  ;;  %v245_v22 = vpop.f32.mrf.mxu1 }
  0xe5   :  { %vm352_vm0 = vcmp.ge.f32.partialorder %v336_v19, 0.0  ;;  %v368_v23 = vmul.f32 0.01, %v336_v19  ;;  %vm360_vm1 = vcmp.ge.f32.partialorder %v344_v20, 0.0  ;;  %v376_v24 = vmul.f32 0.01, %v344_v20 }
  0xe6   :  { %v334_v25 = vadd.f32 %v729_v16, %v213_v21  ;;  %v342_v26 = vadd.f32 %v729_v16, %v245_v22  ;;  %v613_v27 = vpop.f32.mrf.mxu0  ;;  %v621_v28 = vpop.f32.mrf.mxu1 }
  0xe7   :  { %v337_v29 = vadd.f32 %v613_v27, %v729_v16  ;;  %v345_v30 = vadd.f32 %v621_v28, %v729_v16  ;;  %v384_v31 = vsel %vm352_vm0, %v336_v19, %v368_v23  ;;  %v392_v32 = vsel %vm360_vm1, %v344_v20, %v376_v24 }
  0xe8   :  { %vm350_vm2 = vcmp.ge.f32.partialorder %v334_v25, 0.0  ;;  %v366_v33 = vmul.f32 0.01, %v334_v25  ;;  %v216_v34 = vpop.f32.mrf.mxu0  ;;  %v248_v35 = vpop.f32.mrf.mxu1  ;;  %vm358_vm5 = vcmp.ge.f32.partialorder %v342_v26, 0.0  ;;  %v374_v38 = vmul.f32 0.01, %v342_v26 }
  0xe9   :  { %vm353_vm3 = vcmp.ge.f32.partialorder %v337_v29, 0.0  ;;  %v369_v36 = vmul.f32 0.01, %v337_v29  ;;  %vm361_vm4 = vcmp.ge.f32.partialorder %v345_v30, 0.0  ;;  %v377_v37 = vmul.f32 0.01, %v345_v30 }
  0xea   :  { %v335_v39 = vadd.f32 %v729_v16, %v216_v34  ;;  %v343_v40 = vadd.f32 %v729_v16, %v248_v35  ;;  %v616_v41 = vpop.f32.mrf.mxu0  ;;  %v624_v42 = vpop.f32.mrf.mxu1  ;;  %v382_v53 = vsel %vm350_vm2, %v334_v25, %v366_v33  ;;  %v390_v58 = vsel %vm358_vm5, %v342_v26, %v374_v38 }
  0xeb   :  { %v385_v43 = vsel %vm353_vm3, %v337_v29, %v369_v36  ;;  %v393_v44 = vsel %vm361_vm4, %v345_v30, %v377_v37  ;;  %v340_v45 = vadd.f32 %v616_v41, %v729_v16  ;;  %v348_v46 = vadd.f32 %v624_v42, %v729_v16 }
  0xec   :  { %v539_v47 = vpack.c.bf16 %v385_v43, %v384_v31  ;;  %v559_v48 = vpack.c.bf16 %v393_v44, %v392_v32  ;;  %vm351_vm6 = vcmp.ge.f32.partialorder %v335_v39, 0.0  ;;  %v367_v49 = vmul.f32 0.01, %v335_v39  ;;  %v229_v50 = vpop.f32.mrf.mxu0  ;;  %v261_v51 = vpop.f32.mrf.mxu1 }
  0xed   :  { %vm359_vm7 = vcmp.ge.f32.partialorder %v343_v40, 0.0  ;;  %v375_v52 = vmul.f32 0.01, %v343_v40  ;;  %v338_v55 = vadd.f32 %v729_v16, %v229_v50  ;;  %v346_v61 = vadd.f32 %v729_v16, %v261_v51 }
  0xee   :  { %571 = vst [vmem:[%s780_s3 + $0x8] sm:$0xff] %v539_v47   ;;  %575 = vst [vmem:[%s780_s3 + $0x28] sm:$0xff] %v559_v48   ;;  %v383_v54 = vsel %vm351_vm6, %v335_v39, %v367_v49  ;;  %v617_v56 = vpop.f32.mrf.mxu0  ;;  %v625_v57 = vpop.f32.mrf.mxu1  ;;  %vm356_vm8 = vcmp.ge.f32.partialorder %v340_v45, 0.0  ;;  %v372_v63 = vmul.f32 0.01, %v340_v45  ;;  %vm364_vm9 = vcmp.ge.f32.partialorder %v348_v46, 0.0 }
  0xef   :  { %v534_v59 = vpack.c.bf16 %v383_v54, %v382_v53  ;;  %v391_v60 = vsel %vm359_vm7, %v343_v40, %v375_v52  ;;  %v380_v2 = vmul.f32 0.01, %v348_v46  ;;  %vm354_vm10 = vcmp.ge.f32.partialorder %v338_v55, 0.0 }
  0xf0   :  { %v554_v62 = vpack.c.bf16 %v391_v60, %v390_v58  ;;  %v232_v0 = vpop.f32.mrf.mxu0  ;;  %v264_v1 = vpop.f32.mrf.mxu1  ;;  %v341_v3 = vadd.f32 %v617_v56, %v729_v16  ;;  %v349_v4 = vadd.f32 %v625_v57, %v729_v16  ;;  %v370_v5 = vmul.f32 0.01, %v338_v55 }
  0xf1   :  { %535 = vst [vmem:[%s780_s3] sm:$0xff] %v534_v59   ;;  %vm362_vm11 = vcmp.ge.f32.partialorder %v346_v61, 0.0  ;;  %v339_v6 = vadd.f32 %v729_v16, %v232_v0  ;;  %v347_v7 = vadd.f32 %v729_v16, %v264_v1  ;;  %v378_v8 = vmul.f32 0.01, %v346_v61 }
  0xf2   :  { %574 = vst [vmem:[%s780_s3 + $0x20] sm:$0xff] %v554_v62   ;;  %vm357_vm12 = vcmp.ge.f32.partialorder %v341_v3, 0.0  ;;  %v373_v9 = vmul.f32 0.01, %v341_v3  ;;  %vm365_vm13 = vcmp.ge.f32.partialorder %v349_v4, 0.0  ;;  %v388_v12 = vsel %vm356_vm8, %v340_v45, %v372_v63 }
  0xf3   :  { %v381_v10 = vmul.f32 0.01, %v349_v4  ;;  %vm355_vm14 = vcmp.ge.f32.partialorder %v339_v6, 0.0  ;;  %v371_v11 = vmul.f32 0.01, %v339_v6  ;;  %vm363_vm15 = vcmp.ge.f32.partialorder %v347_v7, 0.0 }
  0xf4   :  { %v396_v13 = vsel %vm364_vm9, %v348_v46, %v380_v2  ;;  %v389_v14 = vsel %vm357_vm12, %v341_v3, %v373_v9  ;;  %v379_v15 = vmul.f32 0.01, %v347_v7  ;;  %v386_v17 = vsel %vm354_vm10, %v338_v55, %v370_v5 }
  0xf5   :  { %v549_v18 = vpack.c.bf16 %v389_v14, %v388_v12  ;;  %v397_v19 = vsel %vm365_vm13, %v349_v4, %v381_v10  ;;  %v387_v20 = vsel %vm355_vm14, %v339_v6, %v371_v11  ;;  %v394_v16 = vsel %vm362_vm11, %v346_v61, %v378_v8 }
  0xf6   :  { %v569_v21 = vpack.c.bf16 %v397_v19, %v396_v13  ;;  %v544_v22 = vpack.c.bf16 %v387_v20, %v386_v17  ;;  %v395_v23 = vsel %vm363_vm15, %v347_v7, %v379_v15 }
  0xf7   :  { %573 = vst [vmem:[%s780_s3 + $0x18] sm:$0xff] %v549_v18   ;;  %v564_v24 = vpack.c.bf16 %v395_v23, %v394_v16 }
  0xf8   :  { %577 = vst [vmem:[%s780_s3 + $0x38] sm:$0xff] %v569_v21   ;;  %572 = vst [vmem:[%s780_s3 + $0x10] sm:$0xff] %v544_v22  }
  0xf9   :  { %576 = vst [vmem:[%s780_s3 + $0x30] sm:$0xff] %v564_v24  }

// kernel: _lambda_.7
= control target key start
LH: loop header
LB: loop body
LE: loop exit
PB: predicated region body
PF: predicated region fallthrough
CT: control target
= control target key end

     0   :  { %s347_s1 = inlined_call_operand.vmem [shape: bf16[1,128,128], index: 1, kind: input, shape index: {}]   ;;  %s348_s0 = inlined_call_operand.vmem [shape: bf16[1,32,128], index: 0, kind: input, shape index: {}]   ;;  %s349_s2 = inlined_call_operand.vmem [shape: f32[1,1,128], index: 2, kind: input, shape index: {}]   ;;  %s350_s3 = inlined_call_operand.vmem [shape: bf16[1,32,128], index: 3, kind: output, shape index: {}]  }
   0x1   :  { %v278_v0 = vld [vmem:[%s347_s1 + $0x38] sm:$0xff]   ;;  %v279_v1 = vld [vmem:[%s347_s1 + $0x30] sm:$0xff]   ;;  %v280_v2 = vld [vmem:[%s347_s1 + $0x28] sm:$0xff]  }
   0x2   :  { %258 = vmatprep.subr.bf16.mxu0 %v278_v0  ;;  %v281_v3 = vld [vmem:[%s347_s1 + $0x20] sm:$0xff]   ;;  %v282_v5 = vld [vmem:[%s347_s1 + $0x18] sm:$0xff]   ;;  %v283_v6 = vld [vmem:[%s347_s1 + $0x10] sm:$0xff]  }
   0x3   :  { %259 = vmatpush3.bf16.msra.mxu0 %v278_v0  ;;  %v286_v4 = vld [vmem:[%s348_s0] sm:$0xff]   ;;  %v284_v7 = vld [vmem:[%s347_s1 + $0x8] sm:$0xff]  }
   0x4   :  { %260 = vmatprep.subr.bf16.mxu0 %v279_v1  ;;  %274 = vmatprep.mubr.bf16.mxu0 %v286_v4  ;;  %v285_v8 = vld [vmem:[%s347_s1] sm:$0xff]   ;;  %v287_v9 = vld [vmem:[%s348_s0 + $0x8] sm:$0xff]  }
   0x5   :  { %v228_v10 = vld [vmem:[%s349_s2] ss:$0 sm:$0xff] }
   0x7   :  { %261 = vmatpush3.bf16.msra.mxu0 %v279_v1 }
   0x8   :  { %262 = vmatprep.subr.bf16.mxu0 %v280_v2 }
   0xb   :  { %263 = vmatpush3.bf16.msra.mxu0 %v280_v2 }
   0xc   :  { %264 = vmatprep.subr.bf16.mxu0 %v281_v3 }
   0xf   :  { %265 = vmatpush3.bf16.msra.mxu0 %v281_v3 }
  0x10   :  { %266 = vmatprep.subr.bf16.mxu0 %v282_v5 }
  0x13   :  { %267 = vmatpush3.bf16.msra.mxu0 %v282_v5 }
  0x14   :  { %268 = vmatprep.subr.bf16.mxu0 %v283_v6 }
  0x17   :  { %269 = vmatpush3.bf16.msra.mxu0 %v283_v6 }
  0x18   :  { %270 = vmatprep.subr.bf16.mxu0 %v284_v7 }
  0x1b   :  { %271 = vmatpush3.bf16.msra.mxu0 %v284_v7 }
  0x1c   :  { %272 = vmatprep.subr.bf16.mxu0 %v285_v8 }
  0x1f   :  { %273 = vmatpush3.bf16.msra.mxu0 %v285_v8 }
  0x22   :  { %275 = vmatmul.mubr.bf16.vlgmr.msra.gmra.mxu0 %v287_v9 }
  0xe2   :  { %v276_v11 = vpop.f32.mrf.mxu0 }
  0xe3   :  { %v180_v12 = vadd.f32 %v276_v11, %v228_v10 }
  0xe4   :  { %v141_v13 = vpop.f32.mrf.mxu0 }
  0xe5   :  { %v178_v14 = vadd.f32 %v228_v10, %v141_v13  ;;  %v188_v16 = vmul.f32 0.01, %v180_v12  ;;  %vm184_vm0 = vcmp.ge.f32.partialorder %v180_v12, 0.0 }
  0xe6   :  { %v277_v15 = vpop.f32.mrf.mxu0 }
  0xe7   :  { %v181_v17 = vadd.f32 %v277_v15, %v228_v10  ;;  %v186_v19 = vmul.f32 0.01, %v178_v14  ;;  %vm182_vm2 = vcmp.ge.f32.partialorder %v178_v14, 0.0  ;;  %v192_v22 = vsel %vm184_vm0, %v180_v12, %v188_v16 }
  0xe8   :  { %v144_v18 = vpop.f32.mrf.mxu0 }
  0xe9   :  { %vm185_vm1 = vcmp.ge.f32.partialorder %v181_v17, 0.0  ;;  %v189_v20 = vmul.f32 0.01, %v181_v17  ;;  %v179_v21 = vadd.f32 %v228_v10, %v144_v18  ;;  %v190_v26 = vsel %vm182_vm2, %v178_v14, %v186_v19 }
  0xeb   :  { %v193_v23 = vsel %vm185_vm1, %v181_v17, %v189_v20  ;;  %vm183_vm3 = vcmp.ge.f32.partialorder %v179_v21, 0.0  ;;  %v187_v24 = vmul.f32 0.01, %v179_v21 }
  0xec   :  { %v245_v25 = vpack.c.bf16 %v193_v23, %v192_v22 }
  0xed   :  { %v191_v27 = vsel %vm183_vm3, %v179_v21, %v187_v24 }
  0xee   :  { %247 = vst [vmem:[%s350_s3 + $0x8] sm:$0xff] %v245_v25   ;;  %v240_v28 = vpack.c.bf16 %v191_v27, %v190_v26 }
  0xf0   :  { %241 = vst [vmem:[%s350_s3] sm:$0xff] %v240_v28  }

// kernel: _lambda_.8
= control target key start
LH: loop header
LB: loop body
LE: loop exit
PB: predicated region body
PF: predicated region fallthrough
CT: control target
= control target key end

     0   :  { %s391_s1 = inlined_call_operand.vmem [shape: bf16[1,256,128], index: 1, kind: input, shape index: {}]   ;;  %s392_s0 = inlined_call_operand.vmem [shape: bf16[1,16,256], index: 0, kind: input, shape index: {}]   ;;  %s393_s2 = inlined_call_operand.vmem [shape: f32[1,1,128], index: 2, kind: input, shape index: {}]   ;;  %s394_s3 = inlined_call_operand.vmem [shape: bf16[1,16,128], index: 3, kind: output, shape index: {}]  }
   0x1   :  { %v292_v0 = vld [vmem:[%s391_s1 + $0x78] sm:$0xff]   ;;  %v294_v2 = vld [vmem:[%s391_s1 + $0x70] sm:$0xff]   ;;  %v296_v4 = vld [vmem:[%s391_s1 + $0x68] sm:$0xff]  }
   0x2   :  { %v293_v1 = vld [vmem:[%s391_s1 + $0x38] sm:$0xff]   ;;  %270 = vmatprep.subr.bf16.mxu0 %v292_v0  ;;  %v295_v3 = vld [vmem:[%s391_s1 + $0x30] sm:$0xff]   ;;  %v297_v5 = vld [vmem:[%s391_s1 + $0x28] sm:$0xff]  }
   0x3   :  { %271 = vmatpush3.bf16.msra.mxu0 %v293_v1  ;;  %v298_v6 = vld [vmem:[%s391_s1 + $0x60] sm:$0xff]   ;;  %v300_v8 = vld [vmem:[%s391_s1 + $0x58] sm:$0xff]   ;;  %v302_v10 = vld [vmem:[%s391_s1 + $0x50] sm:$0xff]  }
   0x4   :  { %272 = vmatprep.subr.bf16.mxu0 %v294_v2  ;;  %v299_v7 = vld [vmem:[%s391_s1 + $0x20] sm:$0xff]   ;;  %v301_v9 = vld [vmem:[%s391_s1 + $0x18] sm:$0xff]   ;;  %v303_v12 = vld [vmem:[%s391_s1 + $0x10] sm:$0xff]  }
   0x5   :  { %v310_v11 = vld [vmem:[%s392_s0 + $0x4] ss:$8 sps:$4 sm:$0xff]   ;;  %v308_v17 = vld [vmem:[%s392_s0] ss:$8 sps:$4 sm:$0xff]  }
   0x6   :  { %195 = vmatprep.mubr.bf16.mxu0 %v310_v11  ;;  %v304_v13 = vld [vmem:[%s391_s1 + $0x48] sm:$0xff]   ;;  %v306_v15 = vld [vmem:[%s391_s1 + $0x40] sm:$0xff]  }
   0x7   :  { %273 = vmatpush3.bf16.msra.mxu0 %v295_v3  ;;  %v305_v14 = vld [vmem:[%s391_s1 + $0x8] sm:$0xff]   ;;  %v307_v16 = vld [vmem:[%s391_s1] sm:$0xff]  }
   0x8   :  { %274 = vmatprep.subr.bf16.mxu0 %v296_v4  ;;  %v260_v20 = vld [vmem:[%s393_s2] ss:$0 sm:$0xff] }
   0xb   :  { %275 = vmatpush3.bf16.msra.mxu0 %v297_v5 }
   0xc   :  { %276 = vmatprep.subr.bf16.mxu0 %v298_v6 }
   0xf   :  { %277 = vmatpush3.bf16.msra.mxu0 %v299_v7 }
  0x10   :  { %278 = vmatprep.subr.bf16.mxu0 %v300_v8 }
  0x13   :  { %279 = vmatpush3.bf16.msra.mxu0 %v301_v9 }
  0x14   :  { %280 = vmatprep.subr.bf16.mxu0 %v302_v10 }
  0x17   :  { %281 = vmatpush3.bf16.msra.mxu0 %v303_v12 }
  0x18   :  { %282 = vmatprep.subr.bf16.mxu0 %v304_v13 }
  0x1b   :  { %283 = vmatpush3.bf16.msra.mxu0 %v305_v14 }
  0x1c   :  { %284 = vmatprep.subr.bf16.mxu0 %v306_v15 }
  0x1f   :  { %285 = vmatpush3.bf16.msra.mxu0 %v307_v16 }
  0x22   :  { %196 = vmatmul.mubr.bf16.vlgmr.msra.gmra.mxu0 %v308_v17 }
  0xe2   :  { %v286_v18 = vpop.f32.mrf.mxu0 }
  0xe4   :  { %v287_v19 = vpop.f32.mrf.mxu0 }
  0xe5   :  { %v288_v21 = vadd.f32 %v287_v19, %v286_v18 }
  0xe6   :  { %v289_v22 = vpop.f32.mrf.mxu0 }
  0xe7   :  { %v220_v23 = vadd.f32 %v288_v21, %v260_v20 }
  0xe8   :  { %v290_v24 = vpop.f32.mrf.mxu0 }
  0xe9   :  { %v291_v25 = vadd.f32 %v290_v24, %v289_v22  ;;  %v224_v26 = vmul.f32 0.01, %v220_v23  ;;  %vm222_vm0 = vcmp.ge.f32.partialorder %v220_v23, 0.0 }
  0xeb   :  { %v221_v27 = vadd.f32 %v291_v25, %v260_v20  ;;  %v226_v29 = vsel %vm222_vm0, %v220_v23, %v224_v26 }
  0xed   :  { %vm223_vm1 = vcmp.ge.f32.partialorder %v221_v27, 0.0  ;;  %v225_v28 = vmul.f32 0.01, %v221_v27 }
  0xef   :  { %v227_v30 = vsel %vm223_vm1, %v221_v27, %v225_v28 }
  0xf0   :  { %v268_v31 = vpack.c.bf16 %v227_v30, %v226_v29 }
  0xf2   :  { %269 = vst [vmem:[%s394_s3] sm:$0xff] %v268_v31  }

// kernel: _lambda_.9
= control target key start
LH: loop header
LB: loop body
LE: loop exit
PB: predicated region body
PF: predicated region fallthrough
CT: control target
= control target key end

     0   :  { %s838_s12 = smov 0   ;;  %s840_s13 = smov 0   ;;  %s901_s0 = inlined_call_operand.vmem [shape: bf16[4,16,256], index: 0, kind: input, shape index: {}]   ;;  %s902_s1 = inlined_call_operand.vmem [shape: bf16[4,256,128], index: 1, kind: input, shape index: {}]   ;;  %s903_s2 = inlined_call_operand.vmem [shape: f32[4,1,128], index: 2, kind: input, shape index: {}]   ;;  %s904_s3 = inlined_call_operand.vmem [shape: bf16[4,16,128], index: 3, kind: output, shape index: {}]  }
   0x1   :  { %s842_s14 = smov 0  }
   0x2 LB: > { %s39_s15 = sadd.s32 1, %s812_s13  ;;  %p689_p0 = scmp.ge.s32.totalorder %s816_s14, 1  ;;  %s816_s14 = sphi %s842_s14, %s13_s14   ;;  %s812_s13 = sphi %s840_s13, %s906_s13   ;;  %s808_s12 = sphi %s838_s12, %s905_s12  }
   0x3   : > { %p41_p1 = scmp.ge.s32.totalorder %s39_s15, 4  ;;  %p217_p2 = scmp.lt.s32.totalorder %s816_s14, 5 }
   0x5   : > { %s908_s15 = smov (%p41_p1, %s39_s15), 0  ;;  %p218_p3 = pnand %p689_p0, %p217_p2 }
   0x6   : > { %p277_p4 = scmp.lt.s32.totalorder (!%p218_p3), %s808_s12, 3 }
   0x7   : > { %221 = sbr.rel (%p218_p3) target bundleno = 256 (0x100), region = 32 }
   0xc   : > { %s910_s12 = smov (!%p277_p4, %s808_s12), 3 }
   0xd   : > { %s720_s16 = sshll.u32 %s910_s12, 7  ;;  %s719_s20 = sshll.u32 %s910_s12, 4 }
   0xe   : > { %s862_s19 = scalar_lea.vmem %s902_s1, %s720_s16  ;;  %s288_s23 = scalar_lea.vmem %s901_s0, %s719_s20 }
   0xf   : > { %v775_v0 = vld [vmem:[%s862_s19 + $0x78] sm:$0xff]   ;;  %v777_v2 = vld [vmem:[%s862_s19 + $0x70] sm:$0xff]   ;;  %v779_v4 = vld [vmem:[%s862_s19 + $0x68] sm:$0xff]   ;;  %s309_s26 = scalar_lea.vmem %s903_s2, %s910_s12  ;;  %s721_s27 = sshll.u32 %s910_s12, 3 }
  0x10   : > { %v776_v1 = vld [vmem:[%s862_s19 + $0x38] sm:$0xff]   ;;  %729 = vmatprep.subr.bf16.mxu0 %v775_v0  ;;  %v778_v3 = vld [vmem:[%s862_s19 + $0x30] sm:$0xff]   ;;  %v780_v5 = vld [vmem:[%s862_s19 + $0x28] sm:$0xff]   ;;  %s321_s30 = scalar_lea.vmem %s904_s3, %s721_s27 }
  0x11   : > { %730 = vmatpush3.bf16.msra.mxu0 %v776_v1  ;;  %v781_v6 = vld [vmem:[%s862_s19 + $0x60] sm:$0xff]   ;;  %v783_v8 = vld [vmem:[%s862_s19 + $0x58] sm:$0xff]   ;;  %v785_v10 = vld [vmem:[%s862_s19 + $0x50] sm:$0xff]  }
  0x12   : > { %731 = vmatprep.subr.bf16.mxu0 %v777_v2  ;;  %v782_v7 = vld [vmem:[%s862_s19 + $0x20] sm:$0xff]   ;;  %v784_v9 = vld [vmem:[%s862_s19 + $0x18] sm:$0xff]   ;;  %v786_v12 = vld [vmem:[%s862_s19 + $0x10] sm:$0xff]  }
  0x13   : > { %v793_v11 = vld [vmem:[%s288_s23 + $0x4] ss:$8 sps:$4 sm:$0xff]   ;;  %v791_v17 = vld [vmem:[%s288_s23] ss:$8 sps:$4 sm:$0xff]  }
  0x14   : > { %504 = vmatprep.mubr.bf16.mxu0 %v793_v11  ;;  %v787_v13 = vld [vmem:[%s862_s19 + $0x48] sm:$0xff]   ;;  %v789_v15 = vld [vmem:[%s862_s19 + $0x40] sm:$0xff]  }
  0x15   : > { %732 = vmatpush3.bf16.msra.mxu0 %v778_v3  ;;  %v788_v14 = vld [vmem:[%s862_s19 + $0x8] sm:$0xff]   ;;  %v790_v16 = vld [vmem:[%s862_s19] sm:$0xff]  }
  0x16   : > { %733 = vmatprep.subr.bf16.mxu0 %v779_v4  ;;  %v714_v21 = vld [vmem:[%s309_s26] ss:$0 sm:$0xff] }
  0x19   : > { %734 = vmatpush3.bf16.msra.mxu0 %v780_v5 }
  0x1a   : > { %735 = vmatprep.subr.bf16.mxu0 %v781_v6 }
  0x1d   : > { %736 = vmatpush3.bf16.msra.mxu0 %v782_v7 }
  0x1e   : > { %737 = vmatprep.subr.bf16.mxu0 %v783_v8 }
  0x21   : > { %738 = vmatpush3.bf16.msra.mxu0 %v784_v9 }
  0x22   : > { %739 = vmatprep.subr.bf16.mxu0 %v785_v10 }
  0x25   : > { %740 = vmatpush3.bf16.msra.mxu0 %v786_v12 }
  0x26   : > { %741 = vmatprep.subr.bf16.mxu0 %v787_v13 }
  0x29   : > { %742 = vmatpush3.bf16.msra.mxu0 %v788_v14 }
  0x2a   : > { %743 = vmatprep.subr.bf16.mxu0 %v789_v15 }
  0x2d   : > { %744 = vmatpush3.bf16.msra.mxu0 %v790_v16 }
  0x30   : > { %505 = vmatmul.mubr.bf16.vlgmr.msra.gmra.mxu0 %v791_v17 }
  0xf0   : > { %v745_v18 = vpop.f32.mrf.mxu0 }
  0xf2   : > { %v746_v19 = vpop.f32.mrf.mxu0 }
  0xf3   : > { %v747_v20 = vadd.f32 %v746_v19, %v745_v18 }
  0xf4   : > { %v748_v22 = vpop.f32.mrf.mxu0 }
  0xf5   : > { %v529_v24 = vadd.f32 %v747_v20, %v714_v21 }
  0xf6   : > { %v749_v23 = vpop.f32.mrf.mxu0 }
  0xf7   : > { %v750_v25 = vadd.f32 %v749_v23, %v748_v22  ;;  %v531_v27 = vmax.f32 %v529_v24, 0.0 }
  0xf9   : > { %v530_v26 = vadd.f32 %v750_v25, %v714_v21 }
  0xfb   : > { %v532_v28 = vmax.f32 %v530_v26, 0.0 }
  0xfd   : > { %v727_v29 = vpack.c.bf16 %v532_v28, %v531_v27 }
  0xff   : > { %728 = vst [vmem:[%s321_s30] sm:$0xff] %v727_v29  }
 0x100 PF: > { %s13_s14 = sadd.s32 1, %s816_s14   ;;  %s905_s12 = smov %s812_s13 }
 0x101   : > { %p10_p5 = scmp.ge.s32.totalorder %s13_s14, 6   ;;  %s906_s13 = smov %s908_s15 }
 0x103   :  { %12 = sbr.rel (!%p10_p5) target bundleno = 2 (0x2), region = 76 }

// kernel: _lambda_.10
= control target key start
LH: loop header
LB: loop body
LE: loop exit
PB: predicated region body
PF: predicated region fallthrough
CT: control target
= control target key end

     0   :  { %s919_s12 = smov 0   ;;  %s921_s13 = smov 0   ;;  %s982_s0 = inlined_call_operand.vmem [shape: bf16[4,32,256], index: 0, kind: input, shape index: {}]   ;;  %s983_s1 = inlined_call_operand.vmem [shape: bf16[4,256,128], index: 1, kind: input, shape index: {}]   ;;  %s984_s2 = inlined_call_operand.vmem [shape: f32[4,1,128], index: 2, kind: input, shape index: {}]   ;;  %s985_s3 = inlined_call_operand.vmem [shape: bf16[4,32,128], index: 3, kind: output, shape index: {}]  }
   0x1   :  { %s923_s14 = smov 0  }
   0x2 LB: > { %s39_s15 = sadd.s32 1, %s893_s13  ;;  %p733_p0 = scmp.ge.s32.totalorder %s897_s14, 1  ;;  %s897_s14 = sphi %s923_s14, %s13_s14   ;;  %s893_s13 = sphi %s921_s13, %s987_s13   ;;  %s889_s12 = sphi %s919_s12, %s986_s12  }
   0x3   : > { %p41_p1 = scmp.ge.s32.totalorder %s39_s15, 4  ;;  %p217_p2 = scmp.lt.s32.totalorder %s897_s14, 5 }
   0x5   : > { %s989_s15 = smov (%p41_p1, %s39_s15), 0  ;;  %p218_p3 = pnand %p733_p0, %p217_p2 }
   0x6   : > { %p277_p4 = scmp.lt.s32.totalorder (!%p218_p3), %s889_s12, 3 }
   0x7   : > { %221 = sbr.rel (%p218_p3) target bundleno = 256 (0x100), region = 32 }
   0xc   : > { %s991_s12 = smov (!%p277_p4, %s889_s12), 3 }
   0xd   : > { %s768_s16 = sshll.u32 %s991_s12, 7  ;;  %s767_s20 = sshll.u32 %s991_s12, 5 }
   0xe   : > { %s943_s19 = scalar_lea.vmem %s983_s1, %s768_s16  ;;  %s288_s23 = scalar_lea.vmem %s982_s0, %s767_s20 }
   0xf   : > { %v853_v0 = vld [vmem:[%s943_s19 + $0x78] sm:$0xff]   ;;  %v855_v2 = vld [vmem:[%s943_s19 + $0x70] sm:$0xff]   ;;  %v857_v4 = vld [vmem:[%s943_s19 + $0x68] sm:$0xff]   ;;  %s309_s26 = scalar_lea.vmem %s984_s2, %s991_s12  ;;  %s769_s27 = sshll.u32 %s991_s12, 4 }
  0x10   : > { %v854_v1 = vld [vmem:[%s943_s19 + $0x38] sm:$0xff]   ;;  %785 = vmatprep.subr.bf16.mxu0 %v853_v0  ;;  %813 = vmatprep.subr.bf16.mxu1 %v853_v0  ;;  %v856_v3 = vld [vmem:[%s943_s19 + $0x30] sm:$0xff]   ;;  %v858_v5 = vld [vmem:[%s943_s19 + $0x28] sm:$0xff]   ;;  %s321_s30 = scalar_lea.vmem %s985_s3, %s769_s27 }
  0x11   : > { %786 = vmatpush3.bf16.msra.mxu0 %v854_v1  ;;  %821 = vmatpush3.bf16.msra.mxu1 %v854_v1  ;;  %v859_v6 = vld [vmem:[%s943_s19 + $0x60] sm:$0xff]   ;;  %v861_v8 = vld [vmem:[%s943_s19 + $0x58] sm:$0xff]   ;;  %v863_v10 = vld [vmem:[%s943_s19 + $0x50] sm:$0xff]  }
  0x12   : > { %787 = vmatprep.subr.bf16.mxu0 %v855_v2  ;;  %814 = vmatprep.subr.bf16.mxu1 %v855_v2  ;;  %v860_v7 = vld [vmem:[%s943_s19 + $0x20] sm:$0xff]   ;;  %v862_v9 = vld [vmem:[%s943_s19 + $0x18] sm:$0xff]   ;;  %v864_v13 = vld [vmem:[%s943_s19 + $0x10] sm:$0xff]  }
  0x13   : > { %v871_v11 = vld [vmem:[%s288_s23 + $0x4] ss:$8 sps:$4 sm:$0xff]   ;;  %v874_v12 = vld [vmem:[%s288_s23 + $0x14] ss:$8 sps:$4 sm:$0xff]   ;;  %v869_v18 = vld [vmem:[%s288_s23] ss:$8 sps:$4 sm:$0xff]  }
  0x14   : > { %v865_v14 = vld [vmem:[%s943_s19 + $0x48] sm:$0xff]   ;;  %520 = vmatprep.mubr.bf16.mxu0 %v871_v11  ;;  %528 = vmatprep.mubr.bf16.mxu1 %v874_v12  ;;  %v867_v16 = vld [vmem:[%s943_s19 + $0x40] sm:$0xff]   ;;  %v872_v19 = vld [vmem:[%s288_s23 + $0x10] ss:$8 sps:$4 sm:$0xff]  }
  0x15   : > { %788 = vmatpush3.bf16.msra.mxu0 %v856_v3  ;;  %822 = vmatpush3.bf16.msra.mxu1 %v856_v3  ;;  %v866_v15 = vld [vmem:[%s943_s19 + $0x8] sm:$0xff]   ;;  %v868_v17 = vld [vmem:[%s943_s19] sm:$0xff]  }
  0x16   : > { %789 = vmatprep.subr.bf16.mxu0 %v857_v4  ;;  %815 = vmatprep.subr.bf16.mxu1 %v857_v4  ;;  %v760_v26 = vld [vmem:[%s309_s26] ss:$0 sm:$0xff] }
  0x19   : > { %790 = vmatpush3.bf16.msra.mxu0 %v858_v5  ;;  %823 = vmatpush3.bf16.msra.mxu1 %v858_v5 }
  0x1a   : > { %791 = vmatprep.subr.bf16.mxu0 %v859_v6  ;;  %816 = vmatprep.subr.bf16.mxu1 %v859_v6 }
  0x1d   : > { %792 = vmatpush3.bf16.msra.mxu0 %v860_v7  ;;  %824 = vmatpush3.bf16.msra.mxu1 %v860_v7 }
  0x1e   : > { %793 = vmatprep.subr.bf16.mxu0 %v861_v8  ;;  %817 = vmatprep.subr.bf16.mxu1 %v861_v8 }
  0x21   : > { %794 = vmatpush3.bf16.msra.mxu0 %v862_v9  ;;  %825 = vmatpush3.bf16.msra.mxu1 %v862_v9 }
  0x22   : > { %795 = vmatprep.subr.bf16.mxu0 %v863_v10  ;;  %818 = vmatprep.subr.bf16.mxu1 %v863_v10 }
  0x25   : > { %796 = vmatpush3.bf16.msra.mxu0 %v864_v13  ;;  %826 = vmatpush3.bf16.msra.mxu1 %v864_v13 }
  0x26   : > { %797 = vmatprep.subr.bf16.mxu0 %v865_v14  ;;  %819 = vmatprep.subr.bf16.mxu1 %v865_v14 }
  0x29   : > { %798 = vmatpush3.bf16.msra.mxu0 %v866_v15  ;;  %827 = vmatpush3.bf16.msra.mxu1 %v866_v15 }
  0x2a   : > { %799 = vmatprep.subr.bf16.mxu0 %v867_v16  ;;  %820 = vmatprep.subr.bf16.mxu1 %v867_v16 }
  0x2d   : > { %800 = vmatpush3.bf16.msra.mxu0 %v868_v17  ;;  %828 = vmatpush3.bf16.msra.mxu1 %v868_v17 }
  0x30   : > { %521 = vmatmul.mubr.bf16.vlgmr.msra.gmra.mxu0 %v869_v18  ;;  %529 = vmatmul.mubr.bf16.vlgmr.msra.gmra.mxu1 %v872_v19 }
  0xf0   : > { %v801_v20 = vpop.f32.mrf.mxu0  ;;  %v807_v21 = vpop.f32.mrf.mxu1 }
  0xf2   : > { %v802_v22 = vpop.f32.mrf.mxu0  ;;  %v808_v23 = vpop.f32.mrf.mxu1 }
  0xf3   : > { %v803_v24 = vadd.f32 %v802_v22, %v801_v20  ;;  %v809_v25 = vadd.f32 %v808_v23, %v807_v21 }
  0xf4   : > { %v804_v27 = vpop.f32.mrf.mxu0  ;;  %v810_v28 = vpop.f32.mrf.mxu1 }
  0xf5   : > { %v559_v31 = vadd.f32 %v803_v24, %v760_v26  ;;  %v561_v32 = vadd.f32 %v809_v25, %v760_v26 }
  0xf6   : > { %v805_v29 = vpop.f32.mrf.mxu0  ;;  %v811_v30 = vpop.f32.mrf.mxu1 }
  0xf7   : > { %v806_v33 = vadd.f32 %v805_v29, %v804_v27  ;;  %v812_v34 = vadd.f32 %v811_v30, %v810_v28  ;;  %v563_v37 = vmax.f32 %v559_v31, 0.0  ;;  %v565_v38 = vmax.f32 %v561_v32, 0.0 }
  0xf9   : > { %v560_v35 = vadd.f32 %v806_v33, %v760_v26  ;;  %v562_v36 = vadd.f32 %v812_v34, %v760_v26 }
  0xfb   : > { %v564_v39 = vmax.f32 %v560_v35, 0.0  ;;  %v566_v40 = vmax.f32 %v562_v36, 0.0 }
  0xfd   : > { %v777_v41 = vpack.c.bf16 %v564_v39, %v563_v37  ;;  %v782_v42 = vpack.c.bf16 %v566_v40, %v565_v38 }
  0xff   : > { %778 = vst [vmem:[%s321_s30] sm:$0xff] %v777_v41   ;;  %784 = vst [vmem:[%s321_s30 + $0x8] sm:$0xff] %v782_v42  }
 0x100 PF: > { %s13_s14 = sadd.s32 1, %s897_s14   ;;  %s986_s12 = smov %s893_s13 }
 0x101   : > { %p10_p5 = scmp.ge.s32.totalorder %s13_s14, 6   ;;  %s987_s13 = smov %s989_s15 }
 0x103   :  { %12 = sbr.rel (!%p10_p5) target bundleno = 2 (0x2), region = 76 }

// kernel: _lambda_.11
= control target key start
LH: loop header
LB: loop body
LE: loop exit
PB: predicated region body
PF: predicated region fallthrough
CT: control target
= control target key end

     0   :  { %s1163_s12 = smov 0   ;;  %s1165_s13 = smov 0   ;;  %s1245_s0 = inlined_call_operand.vmem [shape: bf16[4,128,128], index: 0, kind: input, shape index: {}]   ;;  %s1246_s1 = inlined_call_operand.vmem [shape: bf16[4,128,128], index: 1, kind: input, shape index: {}]   ;;  %s1247_s2 = inlined_call_operand.vmem [shape: f32[4,1,128], index: 2, kind: input, shape index: {}]   ;;  %s1248_s3 = inlined_call_operand.vmem [shape: f32[4,128,128], index: 3, kind: output, shape index: {}]  }
   0x1   :  { %s1167_s14 = smov 0  }
   0x2 LB: > { %s39_s15 = sadd.s32 1, %s1137_s13  ;;  %p906_p0 = scmp.ge.s32.totalorder %s1141_s14, 1  ;;  %s1141_s14 = sphi %s1167_s14, %s13_s14   ;;  %s1137_s13 = sphi %s1165_s13, %s1250_s13   ;;  %s1133_s12 = sphi %s1163_s12, %s1249_s12  }
   0x3   : > { %p41_p1 = scmp.ge.s32.totalorder %s39_s15, 4  ;;  %p214_p2 = scmp.lt.s32.totalorder %s1141_s14, 5 }
   0x5   : > { %s1252_s15 = smov (%p41_p1, %s39_s15), 0  ;;  %p215_p3 = pnand %p906_p0, %p214_p2 }
   0x6   : > { %p271_p4 = scmp.lt.s32.totalorder (!%p215_p3), %s1133_s12, 3 }
   0x7   : > { %218 = sbr.rel (%p215_p3) target bundleno = 291 (0x123), region = 32 }
   0xc   : > { %s1254_s12 = smov (!%p271_p4, %s1133_s12), 3 }
   0xd   : > { %s948_s16 = sshll.u32 %s1254_s12, 6  ;;  %s301_s25 = scalar_lea.vmem %s1247_s2, %s1254_s12 }
   0xe   : > { %s1187_s19 = scalar_lea.vmem %s1246_s1, %s948_s16  ;;  %s1195_s22 = scalar_lea.vmem %s1245_s0, %s948_s16  ;;  %v929_v16 = vld [vmem:[%s301_s25] ss:$0 sm:$0xff] }
   0xf   : > { %v1039_v0 = vld [vmem:[%s1187_s19 + $0x38] sm:$0xff]   ;;  %v1040_v1 = vld [vmem:[%s1187_s19 + $0x30] sm:$0xff]   ;;  %v1041_v2 = vld [vmem:[%s1187_s19 + $0x28] sm:$0xff]   ;;  %s950_s26 = sshll.u32 %s1254_s12, 7 }
  0x10   : > { %967 = vmatprep.subr.bf16.mxu0 %v1039_v0  ;;  %999 = vmatprep.subr.bf16.mxu1 %v1039_v0  ;;  %v1042_v3 = vld [vmem:[%s1187_s19 + $0x20] sm:$0xff]   ;;  %v1043_v6 = vld [vmem:[%s1187_s19 + $0x18] sm:$0xff]   ;;  %v1044_v7 = vld [vmem:[%s1187_s19 + $0x10] sm:$0xff]   ;;  %s1218_s29 = scalar_lea.vmem %s1248_s3, %s950_s26 }
  0x11   : > { %968 = vmatpush3.bf16.msra.mxu0 %v1039_v0  ;;  %1007 = vmatpush3.bf16.msra.mxu1 %v1039_v0  ;;  %v1047_v4 = vld [vmem:[%s1195_s22] sm:$0xff]   ;;  %v1045_v8 = vld [vmem:[%s1187_s19 + $0x8] sm:$0xff]   ;;  %v1051_v12 = vld [vmem:[%s1195_s22 + $0x10] sm:$0xff]  }
  0x12   : > { %969 = vmatprep.subr.bf16.mxu0 %v1040_v1  ;;  %1000 = vmatprep.subr.bf16.mxu1 %v1040_v1  ;;  %v1048_v5 = vld [vmem:[%s1195_s22 + $0x20] sm:$0xff]   ;;  %v1049_v10 = vld [vmem:[%s1195_s22 + $0x8] sm:$0xff]   ;;  %v1052_v13 = vld [vmem:[%s1195_s22 + $0x30] sm:$0xff]  }
  0x13   : > { %983 = vmatprep.mubr.bf16.mxu0 %v1047_v4  ;;  %991 = vmatprep.mubr.bf16.mxu1 %v1048_v5  ;;  %v1046_v9 = vld [vmem:[%s1187_s19] sm:$0xff]   ;;  %v1050_v11 = vld [vmem:[%s1195_s22 + $0x28] sm:$0xff]   ;;  %v1053_v14 = vld [vmem:[%s1195_s22 + $0x18] sm:$0xff]  }
  0x14   : > { %v1054_v15 = vld [vmem:[%s1195_s22 + $0x38] sm:$0xff]  }
  0x15   : > { %970 = vmatpush3.bf16.msra.mxu0 %v1040_v1  ;;  %1008 = vmatpush3.bf16.msra.mxu1 %v1040_v1 }
  0x16   : > { %971 = vmatprep.subr.bf16.mxu0 %v1041_v2  ;;  %1001 = vmatprep.subr.bf16.mxu1 %v1041_v2 }
  0x19   : > { %972 = vmatpush3.bf16.msra.mxu0 %v1041_v2  ;;  %1009 = vmatpush3.bf16.msra.mxu1 %v1041_v2 }
  0x1a   : > { %973 = vmatprep.subr.bf16.mxu0 %v1042_v3  ;;  %1002 = vmatprep.subr.bf16.mxu1 %v1042_v3 }
  0x1d   : > { %974 = vmatpush3.bf16.msra.mxu0 %v1042_v3  ;;  %1010 = vmatpush3.bf16.msra.mxu1 %v1042_v3 }
  0x1e   : > { %975 = vmatprep.subr.bf16.mxu0 %v1043_v6  ;;  %1003 = vmatprep.subr.bf16.mxu1 %v1043_v6 }
  0x21   : > { %976 = vmatpush3.bf16.msra.mxu0 %v1043_v6  ;;  %1011 = vmatpush3.bf16.msra.mxu1 %v1043_v6 }
  0x22   : > { %977 = vmatprep.subr.bf16.mxu0 %v1044_v7  ;;  %1004 = vmatprep.subr.bf16.mxu1 %v1044_v7 }
  0x25   : > { %978 = vmatpush3.bf16.msra.mxu0 %v1044_v7  ;;  %1012 = vmatpush3.bf16.msra.mxu1 %v1044_v7 }
  0x26   : > { %979 = vmatprep.subr.bf16.mxu0 %v1045_v8  ;;  %1005 = vmatprep.subr.bf16.mxu1 %v1045_v8 }
  0x29   : > { %980 = vmatpush3.bf16.msra.mxu0 %v1045_v8  ;;  %1013 = vmatpush3.bf16.msra.mxu1 %v1045_v8 }
  0x2a   : > { %981 = vmatprep.subr.bf16.mxu0 %v1046_v9  ;;  %1006 = vmatprep.subr.bf16.mxu1 %v1046_v9 }
  0x2d   : > { %982 = vmatpush3.bf16.msra.mxu0 %v1046_v9  ;;  %1014 = vmatpush3.bf16.msra.mxu1 %v1046_v9 }
  0x30   : > { %984 = vmatmul.mubr.bf16.vlgmr.msra.gmra.mxu0 %v1049_v10  ;;  %992 = vmatmul.mubr.bf16.vlgmr.msra.gmra.mxu1 %v1050_v11 }
  0x31   : > { %987 = vmatprep.mubr.bf16.mxu0 %v1051_v12  ;;  %995 = vmatprep.mubr.bf16.mxu1 %v1052_v13 }
  0x38   : > { %988 = vmatmul.mubr.bf16.gmra.mxu0 %v1053_v14  ;;  %996 = vmatmul.mubr.bf16.gmra.mxu1 %v1054_v15 }
  0xf0   : > { %v985_v17 = vpop.f32.mrf.mxu0  ;;  %v993_v18 = vpop.f32.mrf.mxu1 }
  0xf1   : > { %v637_v19 = vadd.f32 %v985_v17, %v929_v16  ;;  %v645_v20 = vadd.f32 %v993_v18, %v929_v16 }
  0xf2   : > { %v514_v21 = vpop.f32.mrf.mxu0  ;;  %v546_v22 = vpop.f32.mrf.mxu1 }
  0xf3   : > { %v932_v23 = vmul.f32 -1.442695, %v637_v19  ;;  %v940_v24 = vmul.f32 -1.442695, %v645_v20  ;;  %v635_v25 = vadd.f32 %v929_v16, %v514_v21  ;;  %v643_v26 = vadd.f32 %v929_v16, %v546_v22 }
  0xf4   : > { %v986_v27 = vpop.f32.mrf.mxu0  ;;  %v994_v28 = vpop.f32.mrf.mxu1 }
  0xf5   : > { %1055 = vpow2.f32 %v932_v23  ;;  %v930_v29 = vmul.f32 -1.442695, %v635_v25  ;;  %v938_v30 = vmul.f32 -1.442695, %v643_v26  ;;  %v638_v31 = vadd.f32 %v986_v27, %v929_v16 }
  0xf6   : > { %1057 = vpow2.f32 %v940_v24  ;;  %v646_v32 = vadd.f32 %v994_v28, %v929_v16  ;;  %v517_v33 = vpop.f32.mrf.mxu0  ;;  %v549_v34 = vpop.f32.mrf.mxu1 }
  0xf7   : > { %1059 = vpow2.f32 %v930_v29  ;;  %v933_v35 = vmul.f32 -1.442695, %v638_v31  ;;  %v636_v36 = vadd.f32 %v929_v16, %v517_v33  ;;  %v644_v37 = vadd.f32 %v929_v16, %v549_v34 }
  0xf8   : > { %1061 = vpow2.f32 %v938_v30  ;;  %v941_v38 = vmul.f32 -1.442695, %v646_v32  ;;  %v989_v39 = vpop.f32.mrf.mxu0  ;;  %v997_v40 = vpop.f32.mrf.mxu1 }
  0xf9   : > { %1063 = vpow2.f32 %v933_v35  ;;  %v931_v41 = vmul.f32 -1.442695, %v636_v36  ;;  %v939_v42 = vmul.f32 -1.442695, %v644_v37  ;;  %v641_v43 = vadd.f32 %v989_v39, %v929_v16 }
  0xfa   : > { %1065 = vpow2.f32 %v941_v38  ;;  %v649_v44 = vadd.f32 %v997_v40, %v929_v16  ;;  %v530_v45 = vpop.f32.mrf.mxu0  ;;  %v562_v46 = vpop.f32.mrf.mxu1 }
  0xfb   : > { %1067 = vpow2.f32 %v931_v41  ;;  %v936_v47 = vmul.f32 -1.442695, %v641_v43  ;;  %v639_v48 = vadd.f32 %v929_v16, %v530_v45  ;;  %v647_v49 = vadd.f32 %v929_v16, %v562_v46 }
  0xfc   : > { %1069 = vpow2.f32 %v939_v42  ;;  %v944_v50 = vmul.f32 -1.442695, %v649_v44  ;;  %v990_v51 = vpop.f32.mrf.mxu0  ;;  %v998_v52 = vpop.f32.mrf.mxu1 }
  0xfd   : > { %1071 = vpow2.f32 %v936_v47  ;;  %v934_v53 = vmul.f32 -1.442695, %v639_v48  ;;  %v942_v54 = vmul.f32 -1.442695, %v647_v49  ;;  %v642_v55 = vadd.f32 %v990_v51, %v929_v16 }
  0xfe   : > { %1073 = vpow2.f32 %v944_v50  ;;  %v650_v56 = vadd.f32 %v998_v52, %v929_v16  ;;  %v533_v57 = vpop.f32.mrf.mxu0  ;;  %v565_v58 = vpop.f32.mrf.mxu1 }
  0xff   : > { %1075 = vpow2.f32 %v934_v53  ;;  %v937_v59 = vmul.f32 -1.442695, %v642_v55  ;;  %v640_v60 = vadd.f32 %v929_v16, %v533_v57  ;;  %v648_v61 = vadd.f32 %v929_v16, %v565_v58 }
 0x100   : > { %1077 = vpow2.f32 %v942_v54  ;;  %v945_v62 = vmul.f32 -1.442695, %v650_v56 }
 0x101   : > { %1079 = vpow2.f32 %v937_v59  ;;  %v935_v63 = vmul.f32 -1.442695, %v640_v60  ;;  %v943_v0 = vmul.f32 -1.442695, %v648_v61 }
 0x102   : > { %v1056_v1 = vpop.eup %1055  ;;  %1081 = vpow2.f32 %v945_v62 }
 0x103   : > { %v1058_v2 = vpop.eup %1057  ;;  %v701_v3 = vadd.f32 1.0, %v1056_v1  ;;  %1083 = vpow2.f32 %v935_v63 }
 0x104   : > { %v1060_v4 = vpop.eup %1059  ;;  %v709_v5 = vadd.f32 1.0, %v1058_v2  ;;  %1085 = vpow2.f32 %v943_v0 }
 0x105   : > { %v1062_v6 = vpop.eup %1061  ;;  %1087 = vrcp.f32 %v701_v3  ;;  %v699_v7 = vadd.f32 1.0, %v1060_v4 }
 0x106   : > { %v1064_v8 = vpop.eup %1063  ;;  %1089 = vrcp.f32 %v709_v5  ;;  %v707_v9 = vadd.f32 1.0, %v1062_v6 }
 0x107   : > { %v1066_v10 = vpop.eup %1065  ;;  %1091 = vrcp.f32 %v699_v7  ;;  %v702_v11 = vadd.f32 1.0, %v1064_v8 }
 0x108   : > { %v1068_v12 = vpop.eup %1067  ;;  %1093 = vrcp.f32 %v707_v9  ;;  %v710_v13 = vadd.f32 1.0, %v1066_v10 }
 0x109   : > { %v1070_v14 = vpop.eup %1069  ;;  %1095 = vrcp.f32 %v702_v11  ;;  %v700_v15 = vadd.f32 1.0, %v1068_v12 }
 0x10a   : > { %v1072_v16 = vpop.eup %1071  ;;  %1097 = vrcp.f32 %v710_v13  ;;  %v708_v17 = vadd.f32 1.0, %v1070_v14 }
 0x10b   : > { %v1074_v18 = vpop.eup %1073  ;;  %1099 = vrcp.f32 %v700_v15  ;;  %v705_v19 = vadd.f32 1.0, %v1072_v16 }
 0x10c   : > { %v1076_v20 = vpop.eup %1075  ;;  %1101 = vrcp.f32 %v708_v17  ;;  %v713_v21 = vadd.f32 1.0, %v1074_v18 }
 0x10d   : > { %v1078_v22 = vpop.eup %1077  ;;  %1103 = vrcp.f32 %v705_v19  ;;  %v703_v23 = vadd.f32 1.0, %v1076_v20 }
 0x10e   : > { %v1080_v24 = vpop.eup %1079  ;;  %1105 = vrcp.f32 %v713_v21  ;;  %v711_v25 = vadd.f32 1.0, %v1078_v22 }
 0x10f   : > { %v1082_v26 = vpop.eup %1081  ;;  %1107 = vrcp.f32 %v703_v23  ;;  %v706_v27 = vadd.f32 1.0, %v1080_v24 }
 0x110   : > { %v1084_v28 = vpop.eup %1083  ;;  %1109 = vrcp.f32 %v711_v25  ;;  %v714_v29 = vadd.f32 1.0, %v1082_v26 }
 0x111   : > { %v1086_v30 = vpop.eup %1085  ;;  %1111 = vrcp.f32 %v706_v27  ;;  %v704_v31 = vadd.f32 1.0, %v1084_v28 }
 0x112   : > { %v1088_v32 = vpop.eup %1087  ;;  %1113 = vrcp.f32 %v714_v29  ;;  %v712_v33 = vadd.f32 1.0, %v1086_v30 }
 0x113   : > { %v1090_v34 = vpop.eup %1089  ;;  %749 = vst [vmem:[%s1218_s29 + $0x10] sm:$0xff] %v1088_v32  ;;  %1115 = vrcp.f32 %v704_v31 }
 0x114   : > { %v1092_v35 = vpop.eup %1091  ;;  %757 = vst [vmem:[%s1218_s29 + $0x50] sm:$0xff] %v1090_v34  ;;  %1117 = vrcp.f32 %v712_v33 }
 0x115   : > { %v1094_v36 = vpop.eup %1093  ;;  %747 = vst [vmem:[%s1218_s29] sm:$0xff] %v1092_v35 }
 0x116   : > { %v1096_v37 = vpop.eup %1095  ;;  %755 = vst [vmem:[%s1218_s29 + $0x40] sm:$0xff] %v1094_v36 }
 0x117   : > { %v1098_v38 = vpop.eup %1097  ;;  %750 = vst [vmem:[%s1218_s29 + $0x18] sm:$0xff] %v1096_v37 }
 0x118   : > { %v1100_v39 = vpop.eup %1099  ;;  %758 = vst [vmem:[%s1218_s29 + $0x58] sm:$0xff] %v1098_v38 }
 0x119   : > { %v1102_v40 = vpop.eup %1101  ;;  %748 = vst [vmem:[%s1218_s29 + $0x8] sm:$0xff] %v1100_v39 }
 0x11a   : > { %v1104_v41 = vpop.eup %1103  ;;  %756 = vst [vmem:[%s1218_s29 + $0x48] sm:$0xff] %v1102_v40 }
 0x11b   : > { %v1106_v42 = vpop.eup %1105  ;;  %753 = vst [vmem:[%s1218_s29 + $0x30] sm:$0xff] %v1104_v41 }
 0x11c   : > { %v1108_v43 = vpop.eup %1107  ;;  %761 = vst [vmem:[%s1218_s29 + $0x70] sm:$0xff] %v1106_v42 }
 0x11d   : > { %v1110_v44 = vpop.eup %1109  ;;  %751 = vst [vmem:[%s1218_s29 + $0x20] sm:$0xff] %v1108_v43 }
 0x11e   : > { %v1112_v45 = vpop.eup %1111  ;;  %759 = vst [vmem:[%s1218_s29 + $0x60] sm:$0xff] %v1110_v44 }
 0x11f   : > { %v1114_v46 = vpop.eup %1113  ;;  %754 = vst [vmem:[%s1218_s29 + $0x38] sm:$0xff] %v1112_v45 }
 0x120   : > { %v1116_v47 = vpop.eup %1115  ;;  %762 = vst [vmem:[%s1218_s29 + $0x78] sm:$0xff] %v1114_v46 }
 0x121   : > { %v1118_v48 = vpop.eup %1117  ;;  %752 = vst [vmem:[%s1218_s29 + $0x28] sm:$0xff] %v1116_v47 }
 0x122   : > { %760 = vst [vmem:[%s1218_s29 + $0x68] sm:$0xff] %v1118_v48 }
 0x123 PF: > { %s13_s14 = sadd.s32 1, %s1141_s14   ;;  %s1249_s12 = smov %s1137_s13 }
 0x124   : > { %p10_p5 = scmp.ge.s32.totalorder %s13_s14, 6   ;;  %s1250_s13 = smov %s1252_s15 }
 0x126   :  { %12 = sbr.rel (!%p10_p5) target bundleno = 2 (0x2), region = 76 }

</bundles_post_ra>
